<compile_context>
chip_gen: v6e
topology: v6e:2x2x1
jax: 0.10.0
libtpu: 0.0.40
codegen_flags: <defaults>
</compile_context>

<pallas_src>
import functools

import jax
import jax.numpy as jnp
from jax.experimental import pallas as pl
from jax.experimental.pallas import tpu as pltpu

EPS = 1e-5


def resblock_kernel(x_ref, w1_ref, g1_ref, b1_ref, w2_ref, g2_ref, b2_ref,
                    mask_ref, out_ref, pad_ref, patch_ref, *, width):
    C, M = x_ref.shape
    padw = width + 1            # flat halo: one image row + 1 pixel per side
    inv_m = 1.0 / M

    # Zero only the halo strips of the flat padded buffer (scratch is
    # uninitialized; interior is fully overwritten by each conv).
    pad_ref[:, :padw] = jnp.zeros((C, padw), jnp.float32)
    pad_ref[:, padw + M:] = jnp.zeros((C, padw), jnp.float32)

    def conv3x3(src, w_ref):
        """3x3 same conv as a single (C, 9C) x (9C, M) bf16 MXU matmul."""
        pad_ref[:, padw:padw + M] = src
        for t in range(9):                       # static, unrolled
            dy, dx = t // 3 - 1, t % 3 - 1
            start = padw + dy * width + dx       # static lane offset in [0, 2*padw]
            tap = pad_ref[:, start:start + M]    # lane-shifted view of the activation
            # mask zeroes taps that fall outside the HxW image ("same" padding)
            patch_ref[t * C:(t + 1) * C, :] = tap * mask_ref[t:t + 1, :]
        patch = patch_ref[...].astype(jnp.bfloat16)
        return jnp.dot(w_ref[...], patch, preferred_element_type=jnp.float32)

    def batchnorm(acc, g_ref, b_ref):
        """Training-mode BN (biased batch stats), fused scale/shift."""
        s = jnp.sum(acc, axis=1, keepdims=True)          # (C, 1)
        ss = jnp.sum(acc * acc, axis=1, keepdims=True)   # (C, 1)
        mean = s * inv_m
        var = ss * inv_m - mean * mean
        scale = g_ref[...] * jax.lax.rsqrt(var + EPS)
        shift = b_ref[...] - mean * scale
        return acc * scale + shift

    out1 = jnp.maximum(batchnorm(conv3x3(x_ref[...], w1_ref), g1_ref, b1_ref), 0.0)
    out2 = batchnorm(conv3x3(out1, w2_ref), g2_ref, b2_ref)
    out_ref[...] = jnp.maximum(out2 + x_ref[...], 0.0)   # residual add + ReLU


def generator_residual_module(x_nchw, w1, g1, b1, w2, g2, b2):
    """x_nchw: (N, C, H, W) f32. w1/w2: (C, C, 3, 3) OIHW. g*/b*: (C,)."""
    N, C, H, W = x_nchw.shape
    M = N * H * W
    padw = W + 1

    # ---- layout plumbing (outside the kernel) ----
    x_flat = jnp.transpose(x_nchw, (1, 0, 2, 3)).reshape(C, M).astype(jnp.float32)
    w1_k = jnp.transpose(w1, (0, 2, 3, 1)).reshape(C, 9 * C).astype(jnp.bfloat16)
    w2_k = jnp.transpose(w2, (0, 2, 3, 1)).reshape(C, 9 * C).astype(jnp.bfloat16)
    g1_k = g1.reshape(C, 1).astype(jnp.float32)
    b1_k = b1.reshape(C, 1).astype(jnp.float32)
    g2_k = g2.reshape(C, 1).astype(jnp.float32)
    b2_k = b2.reshape(C, 1).astype(jnp.float32)

    # Per-tap validity mask over the flattened (n, y, x) axis: zero where the
    # shifted read would land outside the HxW image (implements padding=1).
    yy, xx = jnp.meshgrid(jnp.arange(H), jnp.arange(W), indexing="ij")
    taps = []
    for ky in range(3):
        for kx in range(3):
            dy, dx = ky - 1, kx - 1
            valid = ((yy + dy >= 0) & (yy + dy < H) &
                     (xx + dx >= 0) & (xx + dx < W))
            taps.append(jnp.tile(valid.reshape(-1), (N,)))
    mask = jnp.stack(taps, axis=0).astype(jnp.float32)          # (9, M)

    vmem = pl.BlockSpec(memory_space=pltpu.MemorySpace.VMEM)
    out_flat = pl.pallas_call(
        functools.partial(resblock_kernel, width=W),
        out_shape=jax.ShapeDtypeStruct((C, M), jnp.float32),
        in_specs=[vmem] * 8,
        out_specs=vmem,
        scratch_shapes=[
            pltpu.VMEM((C, M + 2 * padw), jnp.float32),   # flat-padded activation
            pltpu.VMEM((9 * C, M), jnp.float32),          # shared im2col patch
        ],
        compiler_params=pltpu.CompilerParams(vmem_limit_bytes=32 * 1024 * 1024),
    )(x_flat, w1_k, g1_k, b1_k, w2_k, g2_k, b2_k, mask)

    return jnp.transpose(out_flat.reshape(C, N, H, W), (1, 0, 2, 3))


def reference(x_nchw, w1, g1, b1, w2, g2, b2):
    """Pure-JAX f32 reference matching PyTorch training-mode forward."""
    def conv(x, w):
        return jax.lax.conv_general_dilated(
            x, w, window_strides=(1, 1), padding=((1, 1), (1, 1)),
            dimension_numbers=("NCHW", "OIHW", "NCHW"))

    def bn(x, g, b):
        mean = jnp.mean(x, axis=(0, 2, 3), keepdims=True)
        var = jnp.mean((x - mean) ** 2, axis=(0, 2, 3), keepdims=True)
        return (x - mean) * jax.lax.rsqrt(var + EPS) * g.reshape(1, -1, 1, 1) \
            + b.reshape(1, -1, 1, 1)

    out = jnp.maximum(bn(conv(x_nchw, w1), g1, b1), 0.0)
    out = bn(conv(out, w2), g2, b2)
    return jnp.maximum(out + x_nchw, 0.0)


if __name__ == "__main__":
    N, C, H, W = 2, 4, 16, 16   # inplanes == planes, stride == 1 (residual add requires it)
    key = jax.random.PRNGKey(0)
    kx, k1, k2, kg1, kb1, kg2, kb2 = jax.random.split(key, 7)

    x = jax.random.normal(kx, (N, C, H, W), jnp.float32)
    w1 = 0.1 * jax.random.normal(k1, (C, C, 3, 3), jnp.float32)   # conv1 weight (OIHW)
    w2 = 0.1 * jax.random.normal(k2, (C, C, 3, 3), jnp.float32)   # conv2 weight (OIHW)
    g1 = 1.0 + 0.1 * jax.random.normal(kg1, (C,), jnp.float32)
    b1 = 0.1 * jax.random.normal(kb1, (C,), jnp.float32)
    g2 = 1.0 + 0.1 * jax.random.normal(kg2, (C,), jnp.float32)
    b2 = 0.1 * jax.random.normal(kb2, (C,), jnp.float32)

    out = jax.block_until_ready(generator_residual_module(x, w1, g1, b1, w2, g2, b2))
    ref = jax.block_until_ready(reference(x, w1, g1, b1, w2, g2, b2))

    assert out.shape == (N, C, H, W)
    # bf16 MXU operands (per perf review) vs an all-f32 reference -> relaxed tolerance.
    err = float(jnp.max(jnp.abs(out - ref)))
    assert jnp.allclose(out, ref, atol=5e-2, rtol=5e-2), err
    print("KERNEL_OK")
</pallas_src>

<mosaic_0001>
module attributes {stable_mosaic.version = 11 : i64} {
  func.func @resblock_kernel(%arg0: memref<4x512xf32, #tpu.memory_space<vmem>>, %arg1: memref<4x36xbf16, #tpu.memory_space<vmem>>, %arg2: memref<4x1xf32, #tpu.memory_space<vmem>>, %arg3: memref<4x1xf32, #tpu.memory_space<vmem>>, %arg4: memref<4x36xbf16, #tpu.memory_space<vmem>>, %arg5: memref<4x1xf32, #tpu.memory_space<vmem>>, %arg6: memref<4x1xf32, #tpu.memory_space<vmem>>, %arg7: memref<9x512xf32, #tpu.memory_space<vmem>>, %arg8: memref<4x512xf32, #tpu.memory_space<vmem>>, %arg9: memref<4x546xf32, #tpu.memory_space<vmem>>, %arg10: memref<36x512xf32, #tpu.memory_space<vmem>>) attributes {dimension_semantics = [], scalar_prefetch = 0 : i64, scratch_operands = 2 : i64, tpu.core_type = #tpu.core_type<tc>} {
    %cst = arith.constant 0.000000e+00 : f32
    %0 = vector.broadcast %cst : f32 to vector<4x17xf32>
    %c0 = arith.constant 0 : index
    %c0_0 = arith.constant 0 : index
    %1 = vector.load %arg9[%c0, %c0_0] : memref<4x546xf32, #tpu.memory_space<vmem>>, vector<4x17xf32>
    tpu.vector_store %arg9[%c0, %c0_0], %0 {strides = array<i32>} : memref<4x546xf32, #tpu.memory_space<vmem>>, vector<4x17xf32>,
    %cst_1 = arith.constant 0.000000e+00 : f32
    %2 = vector.broadcast %cst_1 : f32 to vector<4x17xf32>
    %c0_2 = arith.constant 0 : index
    %c529 = arith.constant 529 : index
    %3 = vector.load %arg9[%c0_2, %c529] : memref<4x546xf32, #tpu.memory_space<vmem>>, vector<4x17xf32>
    tpu.vector_store %arg9[%c0_2, %c529], %2 {strides = array<i32>} : memref<4x546xf32, #tpu.memory_space<vmem>>, vector<4x17xf32>,
    %c0_3 = arith.constant 0 : index
    %c0_4 = arith.constant 0 : index
    %4 = vector.load %arg0[%c0_3, %c0_4] : memref<4x512xf32, #tpu.memory_space<vmem>>, vector<4x512xf32>
    %c0_5 = arith.constant 0 : index
    %c17 = arith.constant 17 : index
    %5 = vector.load %arg9[%c0_5, %c17] : memref<4x546xf32, #tpu.memory_space<vmem>>, vector<4x512xf32>
    tpu.vector_store %arg9[%c0_5, %c17], %4 {strides = array<i32>} : memref<4x546xf32, #tpu.memory_space<vmem>>, vector<4x512xf32>,
    %c0_6 = arith.constant 0 : index
    %c0_7 = arith.constant 0 : index
    %6 = vector.load %arg9[%c0_6, %c0_7] : memref<4x546xf32, #tpu.memory_space<vmem>>, vector<4x512xf32>
    %c0_8 = arith.constant 0 : index
    %c0_9 = arith.constant 0 : index
    %7 = vector.load %arg7[%c0_8, %c0_9] : memref<9x512xf32, #tpu.memory_space<vmem>>, vector<1x512xf32>
    %8 = vector.broadcast %7 : vector<1x512xf32> to vector<4x512xf32>
    %9 = arith.mulf %6, %8 : vector<4x512xf32>
    %c0_10 = arith.constant 0 : index
    %c0_11 = arith.constant 0 : index
    %10 = vector.load %arg10[%c0_10, %c0_11] : memref<36x512xf32, #tpu.memory_space<vmem>>, vector<4x512xf32>
    tpu.vector_store %arg10[%c0_10, %c0_11], %9 {strides = array<i32>} : memref<36x512xf32, #tpu.memory_space<vmem>>, vector<4x512xf32>,
    %c0_12 = arith.constant 0 : index
    %c1 = arith.constant 1 : index
    %11 = vector.load %arg9[%c0_12, %c1] : memref<4x546xf32, #tpu.memory_space<vmem>>, vector<4x512xf32>
    %c1_13 = arith.constant 1 : index
    %c0_14 = arith.constant 0 : index
    %12 = vector.load %arg7[%c1_13, %c0_14] : memref<9x512xf32, #tpu.memory_space<vmem>>, vector<1x512xf32>
    %13 = vector.broadcast %12 : vector<1x512xf32> to vector<4x512xf32>
    %14 = arith.mulf %11, %13 : vector<4x512xf32>
    %c4 = arith.constant 4 : index
    %c0_15 = arith.constant 0 : index
    %15 = vector.load %arg10[%c4, %c0_15] : memref<36x512xf32, #tpu.memory_space<vmem>>, vector<4x512xf32>
    tpu.vector_store %arg10[%c4, %c0_15], %14 {strides = array<i32>} : memref<36x512xf32, #tpu.memory_space<vmem>>, vector<4x512xf32>,
    %c0_16 = arith.constant 0 : index
    %c2 = arith.constant 2 : index
    %16 = vector.load %arg9[%c0_16, %c2] : memref<4x546xf32, #tpu.memory_space<vmem>>, vector<4x512xf32>
    %c2_17 = arith.constant 2 : index
    %c0_18 = arith.constant 0 : index
    %17 = vector.load %arg7[%c2_17, %c0_18] : memref<9x512xf32, #tpu.memory_space<vmem>>, vector<1x512xf32>
    %18 = vector.broadcast %17 : vector<1x512xf32> to vector<4x512xf32>
    %19 = arith.mulf %16, %18 : vector<4x512xf32>
    %c8 = arith.constant 8 : index
    %c0_19 = arith.constant 0 : index
    %20 = vector.load %arg10[%c8, %c0_19] : memref<36x512xf32, #tpu.memory_space<vmem>>, vector<4x512xf32>
    tpu.vector_store %arg10[%c8, %c0_19], %19 {strides = array<i32>} : memref<36x512xf32, #tpu.memory_space<vmem>>, vector<4x512xf32>,
    %c0_20 = arith.constant 0 : index
    %c16 = arith.constant 16 : index
    %21 = vector.load %arg9[%c0_20, %c16] : memref<4x546xf32, #tpu.memory_space<vmem>>, vector<4x512xf32>
    %c3 = arith.constant 3 : index
    %c0_21 = arith.constant 0 : index
    %22 = vector.load %arg7[%c3, %c0_21] : memref<9x512xf32, #tpu.memory_space<vmem>>, vector<1x512xf32>
    %23 = vector.broadcast %22 : vector<1x512xf32> to vector<4x512xf32>
    %24 = arith.mulf %21, %23 : vector<4x512xf32>
    %c12 = arith.constant 12 : index
    %c0_22 = arith.constant 0 : index
    %25 = vector.load %arg10[%c12, %c0_22] : memref<36x512xf32, #tpu.memory_space<vmem>>, vector<4x512xf32>
    tpu.vector_store %arg10[%c12, %c0_22], %24 {strides = array<i32>} : memref<36x512xf32, #tpu.memory_space<vmem>>, vector<4x512xf32>,
    %c0_23 = arith.constant 0 : index
    %c17_24 = arith.constant 17 : index
    %26 = vector.load %arg9[%c0_23, %c17_24] : memref<4x546xf32, #tpu.memory_space<vmem>>, vector<4x512xf32>
    %c4_25 = arith.constant 4 : index
    %c0_26 = arith.constant 0 : index
    %27 = vector.load %arg7[%c4_25, %c0_26] : memref<9x512xf32, #tpu.memory_space<vmem>>, vector<1x512xf32>
    %28 = vector.broadcast %27 : vector<1x512xf32> to vector<4x512xf32>
    %29 = arith.mulf %26, %28 : vector<4x512xf32>
    %c16_27 = arith.constant 16 : index
    %c0_28 = arith.constant 0 : index
    %30 = vector.load %arg10[%c16_27, %c0_28] : memref<36x512xf32, #tpu.memory_space<vmem>>, vector<4x512xf32>
    tpu.vector_store %arg10[%c16_27, %c0_28], %29 {strides = array<i32>} : memref<36x512xf32, #tpu.memory_space<vmem>>, vector<4x512xf32>,
    %c0_29 = arith.constant 0 : index
    %c18 = arith.constant 18 : index
    %31 = vector.load %arg9[%c0_29, %c18] : memref<4x546xf32, #tpu.memory_space<vmem>>, vector<4x512xf32>
    %c5 = arith.constant 5 : index
    %c0_30 = arith.constant 0 : index
    %32 = vector.load %arg7[%c5, %c0_30] : memref<9x512xf32, #tpu.memory_space<vmem>>, vector<1x512xf32>
    %33 = vector.broadcast %32 : vector<1x512xf32> to vector<4x512xf32>
    %34 = arith.mulf %31, %33 : vector<4x512xf32>
    %c20 = arith.constant 20 : index
    %c0_31 = arith.constant 0 : index
    %35 = vector.load %arg10[%c20, %c0_31] : memref<36x512xf32, #tpu.memory_space<vmem>>, vector<4x512xf32>
    tpu.vector_store %arg10[%c20, %c0_31], %34 {strides = array<i32>} : memref<36x512xf32, #tpu.memory_space<vmem>>, vector<4x512xf32>,
    %c0_32 = arith.constant 0 : index
    %c32 = arith.constant 32 : index
    %36 = vector.load %arg9[%c0_32, %c32] : memref<4x546xf32, #tpu.memory_space<vmem>>, vector<4x512xf32>
    %c6 = arith.constant 6 : index
    %c0_33 = arith.constant 0 : index
    %37 = vector.load %arg7[%c6, %c0_33] : memref<9x512xf32, #tpu.memory_space<vmem>>, vector<1x512xf32>
    %38 = vector.broadcast %37 : vector<1x512xf32> to vector<4x512xf32>
    %39 = arith.mulf %36, %38 : vector<4x512xf32>
    %c24 = arith.constant 24 : index
    %c0_34 = arith.constant 0 : index
    %40 = vector.load %arg10[%c24, %c0_34] : memref<36x512xf32, #tpu.memory_space<vmem>>, vector<4x512xf32>
    tpu.vector_store %arg10[%c24, %c0_34], %39 {strides = array<i32>} : memref<36x512xf32, #tpu.memory_space<vmem>>, vector<4x512xf32>,
    %c0_35 = arith.constant 0 : index
    %c33 = arith.constant 33 : index
    %41 = vector.load %arg9[%c0_35, %c33] : memref<4x546xf32, #tpu.memory_space<vmem>>, vector<4x512xf32>
    %c7 = arith.constant 7 : index
    %c0_36 = arith.constant 0 : index
    %42 = vector.load %arg7[%c7, %c0_36] : memref<9x512xf32, #tpu.memory_space<vmem>>, vector<1x512xf32>
    %43 = vector.broadcast %42 : vector<1x512xf32> to vector<4x512xf32>
    %44 = arith.mulf %41, %43 : vector<4x512xf32>
    %c28 = arith.constant 28 : index
    %c0_37 = arith.constant 0 : index
    %45 = vector.load %arg10[%c28, %c0_37] : memref<36x512xf32, #tpu.memory_space<vmem>>, vector<4x512xf32>
    tpu.vector_store %arg10[%c28, %c0_37], %44 {strides = array<i32>} : memref<36x512xf32, #tpu.memory_space<vmem>>, vector<4x512xf32>,
    %c0_38 = arith.constant 0 : index
    %c34 = arith.constant 34 : index
    %46 = vector.load %arg9[%c0_38, %c34] : memref<4x546xf32, #tpu.memory_space<vmem>>, vector<4x512xf32>
    %c8_39 = arith.constant 8 : index
    %c0_40 = arith.constant 0 : index
    %47 = vector.load %arg7[%c8_39, %c0_40] : memref<9x512xf32, #tpu.memory_space<vmem>>, vector<1x512xf32>
    %48 = vector.broadcast %47 : vector<1x512xf32> to vector<4x512xf32>
    %49 = arith.mulf %46, %48 : vector<4x512xf32>
    %c32_41 = arith.constant 32 : index
    %c0_42 = arith.constant 0 : index
    %50 = vector.load %arg10[%c32_41, %c0_42] : memref<36x512xf32, #tpu.memory_space<vmem>>, vector<4x512xf32>
    tpu.vector_store %arg10[%c32_41, %c0_42], %49 {strides = array<i32>} : memref<36x512xf32, #tpu.memory_space<vmem>>, vector<4x512xf32>,
    %c0_43 = arith.constant 0 : index
    %c0_44 = arith.constant 0 : index
    %51 = vector.load %arg10[%c0_43, %c0_44] : memref<36x512xf32, #tpu.memory_space<vmem>>, vector<36x512xf32>
    %52 = arith.truncf %51 : vector<36x512xf32> to vector<36x512xbf16>
    %c0_45 = arith.constant 0 : index
    %c0_46 = arith.constant 0 : index
    %53 = vector.load %arg1[%c0_45, %c0_46] : memref<4x36xbf16, #tpu.memory_space<vmem>>, vector<4x36xbf16>
    %cst_47 = arith.constant dense<0.000000e+00> : vector<4x512xf32>
    %54 = tpu.matmul %53, %52, %cst_47 {dimension_numbers = #tpu.dot_dimension_numbers<[1], [0], [0], [1], [0, 0, 1, 1], [], []>} : vector<4x36xbf16>, vector<36x512xbf16>, vector<4x512xf32> -> vector<4x512xf32>
    %cst_48 = arith.constant dense<0.000000e+00> : vector<4xf32>
    %55 = vector.multi_reduction <add>, %54, %cst_48 [1] : vector<4x512xf32> to vector<4xf32>
    %56 = vector.shape_cast %55 : vector<4xf32> to vector<4x1xf32>
    %57 = arith.mulf %54, %54 : vector<4x512xf32>
    %cst_49 = arith.constant dense<0.000000e+00> : vector<4xf32>
    %58 = vector.multi_reduction <add>, %57, %cst_49 [1] : vector<4x512xf32> to vector<4xf32>
    %59 = vector.shape_cast %58 : vector<4xf32> to vector<4x1xf32>
    %cst_50 = arith.constant 0.001953125 : f32
    %60 = vector.broadcast %cst_50 : f32 to vector<4x1xf32>
    %61 = arith.mulf %56, %60 : vector<4x1xf32>
    %cst_51 = arith.constant 0.001953125 : f32
    %62 = vector.broadcast %cst_51 : f32 to vector<4x1xf32>
    %63 = arith.mulf %59, %62 : vector<4x1xf32>
    %64 = arith.mulf %61, %61 : vector<4x1xf32>
    %65 = arith.subf %63, %64 : vector<4x1xf32>
    %c0_52 = arith.constant 0 : index
    %c0_53 = arith.constant 0 : index
    %66 = vector.load %arg2[%c0_52, %c0_53] : memref<4x1xf32, #tpu.memory_space<vmem>>, vector<4x1xf32>
    %cst_54 = arith.constant 9.99999974E-6 : f32
    %67 = vector.broadcast %cst_54 : f32 to vector<4x1xf32>
    %68 = arith.addf %65, %67 : vector<4x1xf32>
    %69 = math.rsqrt %68 : vector<4x1xf32>
    %70 = arith.mulf %66, %69 : vector<4x1xf32>
    %c0_55 = arith.constant 0 : index
    %c0_56 = arith.constant 0 : index
    %71 = vector.load %arg3[%c0_55, %c0_56] : memref<4x1xf32, #tpu.memory_space<vmem>>, vector<4x1xf32>
    %72 = arith.mulf %61, %70 : vector<4x1xf32>
    %73 = arith.subf %71, %72 : vector<4x1xf32>
    %74 = vector.broadcast %70 : vector<4x1xf32> to vector<4x512xf32>
    %75 = arith.mulf %54, %74 : vector<4x512xf32>
    %76 = vector.broadcast %73 : vector<4x1xf32> to vector<4x512xf32>
    %77 = arith.addf %75, %76 : vector<4x512xf32>
    %cst_57 = arith.constant 0.000000e+00 : f32
    %78 = vector.broadcast %cst_57 : f32 to vector<4x512xf32>
    %79 = arith.maximumf %77, %78 : vector<4x512xf32>
    %c0_58 = arith.constant 0 : index
    %c17_59 = arith.constant 17 : index
    %80 = vector.load %arg9[%c0_58, %c17_59] : memref<4x546xf32, #tpu.memory_space<vmem>>, vector<4x512xf32>
    tpu.vector_store %arg9[%c0_58, %c17_59], %79 {strides = array<i32>} : memref<4x546xf32, #tpu.memory_space<vmem>>, vector<4x512xf32>,
    %c0_60 = arith.constant 0 : index
    %c0_61 = arith.constant 0 : index
    %81 = vector.load %arg9[%c0_60, %c0_61] : memref<4x546xf32, #tpu.memory_space<vmem>>, vector<4x512xf32>
    %c0_62 = arith.constant 0 : index
    %c0_63 = arith.constant 0 : index
    %82 = vector.load %arg7[%c0_62, %c0_63] : memref<9x512xf32, #tpu.memory_space<vmem>>, vector<1x512xf32>
    %83 = vector.broadcast %82 : vector<1x512xf32> to vector<4x512xf32>
    %84 = arith.mulf %81, %83 : vector<4x512xf32>
    %c0_64 = arith.constant 0 : index
    %c0_65 = arith.constant 0 : index
    %85 = vector.load %arg10[%c0_64, %c0_65] : memref<36x512xf32, #tpu.memory_space<vmem>>, vector<4x512xf32>
    tpu.vector_store %arg10[%c0_64, %c0_65], %84 {strides = array<i32>} : memref<36x512xf32, #tpu.memory_space<vmem>>, vector<4x512xf32>,
    %c0_66 = arith.constant 0 : index
    %c1_67 = arith.constant 1 : index
    %86 = vector.load %arg9[%c0_66, %c1_67] : memref<4x546xf32, #tpu.memory_space<vmem>>, vector<4x512xf32>
    %c1_68 = arith.constant 1 : index
    %c0_69 = arith.constant 0 : index
    %87 = vector.load %arg7[%c1_68, %c0_69] : memref<9x512xf32, #tpu.memory_space<vmem>>, vector<1x512xf32>
    %88 = vector.broadcast %87 : vector<1x512xf32> to vector<4x512xf32>
    %89 = arith.mulf %86, %88 : vector<4x512xf32>
    %c4_70 = arith.constant 4 : index
    %c0_71 = arith.constant 0 : index
    %90 = vector.load %arg10[%c4_70, %c0_71] : memref<36x512xf32, #tpu.memory_space<vmem>>, vector<4x512xf32>
    tpu.vector_store %arg10[%c4_70, %c0_71], %89 {strides = array<i32>} : memref<36x512xf32, #tpu.memory_space<vmem>>, vector<4x512xf32>,
    %c0_72 = arith.constant 0 : index
    %c2_73 = arith.constant 2 : index
    %91 = vector.load %arg9[%c0_72, %c2_73] : memref<4x546xf32, #tpu.memory_space<vmem>>, vector<4x512xf32>
    %c2_74 = arith.constant 2 : index
    %c0_75 = arith.constant 0 : index
    %92 = vector.load %arg7[%c2_74, %c0_75] : memref<9x512xf32, #tpu.memory_space<vmem>>, vector<1x512xf32>
    %93 = vector.broadcast %92 : vector<1x512xf32> to vector<4x512xf32>
    %94 = arith.mulf %91, %93 : vector<4x512xf32>
    %c8_76 = arith.constant 8 : index
    %c0_77 = arith.constant 0 : index
    %95 = vector.load %arg10[%c8_76, %c0_77] : memref<36x512xf32, #tpu.memory_space<vmem>>, vector<4x512xf32>
    tpu.vector_store %arg10[%c8_76, %c0_77], %94 {strides = array<i32>} : memref<36x512xf32, #tpu.memory_space<vmem>>, vector<4x512xf32>,
    %c0_78 = arith.constant 0 : index
    %c16_79 = arith.constant 16 : index
    %96 = vector.load %arg9[%c0_78, %c16_79] : memref<4x546xf32, #tpu.memory_space<vmem>>, vector<4x512xf32>
    %c3_80 = arith.constant 3 : index
    %c0_81 = arith.constant 0 : index
    %97 = vector.load %arg7[%c3_80, %c0_81] : memref<9x512xf32, #tpu.memory_space<vmem>>, vector<1x512xf32>
    %98 = vector.broadcast %97 : vector<1x512xf32> to vector<4x512xf32>
    %99 = arith.mulf %96, %98 : vector<4x512xf32>
    %c12_82 = arith.constant 12 : index
    %c0_83 = arith.constant 0 : index
    %100 = vector.load %arg10[%c12_82, %c0_83] : memref<36x512xf32, #tpu.memory_space<vmem>>, vector<4x512xf32>
    tpu.vector_store %arg10[%c12_82, %c0_83], %99 {strides = array<i32>} : memref<36x512xf32, #tpu.memory_space<vmem>>, vector<4x512xf32>,
    %c0_84 = arith.constant 0 : index
    %c17_85 = arith.constant 17 : index
    %101 = vector.load %arg9[%c0_84, %c17_85] : memref<4x546xf32, #tpu.memory_space<vmem>>, vector<4x512xf32>
    %c4_86 = arith.constant 4 : index
    %c0_87 = arith.constant 0 : index
    %102 = vector.load %arg7[%c4_86, %c0_87] : memref<9x512xf32, #tpu.memory_space<vmem>>, vector<1x512xf32>
    %103 = vector.broadcast %102 : vector<1x512xf32> to vector<4x512xf32>
    %104 = arith.mulf %101, %103 : vector<4x512xf32>
    %c16_88 = arith.constant 16 : index
    %c0_89 = arith.constant 0 : index
    %105 = vector.load %arg10[%c16_88, %c0_89] : memref<36x512xf32, #tpu.memory_space<vmem>>, vector<4x512xf32>
    tpu.vector_store %arg10[%c16_88, %c0_89], %104 {strides = array<i32>} : memref<36x512xf32, #tpu.memory_space<vmem>>, vector<4x512xf32>,
    %c0_90 = arith.constant 0 : index
    %c18_91 = arith.constant 18 : index
    %106 = vector.load %arg9[%c0_90, %c18_91] : memref<4x546xf32, #tpu.memory_space<vmem>>, vector<4x512xf32>
    %c5_92 = arith.constant 5 : index
    %c0_93 = arith.constant 0 : index
    %107 = vector.load %arg7[%c5_92, %c0_93] : memref<9x512xf32, #tpu.memory_space<vmem>>, vector<1x512xf32>
    %108 = vector.broadcast %107 : vector<1x512xf32> to vector<4x512xf32>
    %109 = arith.mulf %106, %108 : vector<4x512xf32>
    %c20_94 = arith.constant 20 : index
    %c0_95 = arith.constant 0 : index
    %110 = vector.load %arg10[%c20_94, %c0_95] : memref<36x512xf32, #tpu.memory_space<vmem>>, vector<4x512xf32>
    tpu.vector_store %arg10[%c20_94, %c0_95], %109 {strides = array<i32>} : memref<36x512xf32, #tpu.memory_space<vmem>>, vector<4x512xf32>,
    %c0_96 = arith.constant 0 : index
    %c32_97 = arith.constant 32 : index
    %111 = vector.load %arg9[%c0_96, %c32_97] : memref<4x546xf32, #tpu.memory_space<vmem>>, vector<4x512xf32>
    %c6_98 = arith.constant 6 : index
    %c0_99 = arith.constant 0 : index
    %112 = vector.load %arg7[%c6_98, %c0_99] : memref<9x512xf32, #tpu.memory_space<vmem>>, vector<1x512xf32>
    %113 = vector.broadcast %112 : vector<1x512xf32> to vector<4x512xf32>
    %114 = arith.mulf %111, %113 : vector<4x512xf32>
    %c24_100 = arith.constant 24 : index
    %c0_101 = arith.constant 0 : index
    %115 = vector.load %arg10[%c24_100, %c0_101] : memref<36x512xf32, #tpu.memory_space<vmem>>, vector<4x512xf32>
    tpu.vector_store %arg10[%c24_100, %c0_101], %114 {strides = array<i32>} : memref<36x512xf32, #tpu.memory_space<vmem>>, vector<4x512xf32>,
    %c0_102 = arith.constant 0 : index
    %c33_103 = arith.constant 33 : index
    %116 = vector.load %arg9[%c0_102, %c33_103] : memref<4x546xf32, #tpu.memory_space<vmem>>, vector<4x512xf32>
    %c7_104 = arith.constant 7 : index
    %c0_105 = arith.constant 0 : index
    %117 = vector.load %arg7[%c7_104, %c0_105] : memref<9x512xf32, #tpu.memory_space<vmem>>, vector<1x512xf32>
    %118 = vector.broadcast %117 : vector<1x512xf32> to vector<4x512xf32>
    %119 = arith.mulf %116, %118 : vector<4x512xf32>
    %c28_106 = arith.constant 28 : index
    %c0_107 = arith.constant 0 : index
    %120 = vector.load %arg10[%c28_106, %c0_107] : memref<36x512xf32, #tpu.memory_space<vmem>>, vector<4x512xf32>
    tpu.vector_store %arg10[%c28_106, %c0_107], %119 {strides = array<i32>} : memref<36x512xf32, #tpu.memory_space<vmem>>, vector<4x512xf32>,
    %c0_108 = arith.constant 0 : index
    %c34_109 = arith.constant 34 : index
    %121 = vector.load %arg9[%c0_108, %c34_109] : memref<4x546xf32, #tpu.memory_space<vmem>>, vector<4x512xf32>
    %c8_110 = arith.constant 8 : index
    %c0_111 = arith.constant 0 : index
    %122 = vector.load %arg7[%c8_110, %c0_111] : memref<9x512xf32, #tpu.memory_space<vmem>>, vector<1x512xf32>
    %123 = vector.broadcast %122 : vector<1x512xf32> to vector<4x512xf32>
    %124 = arith.mulf %121, %123 : vector<4x512xf32>
    %c32_112 = arith.constant 32 : index
    %c0_113 = arith.constant 0 : index
    %125 = vector.load %arg10[%c32_112, %c0_113] : memref<36x512xf32, #tpu.memory_space<vmem>>, vector<4x512xf32>
    tpu.vector_store %arg10[%c32_112, %c0_113], %124 {strides = array<i32>} : memref<36x512xf32, #tpu.memory_space<vmem>>, vector<4x512xf32>,
    %c0_114 = arith.constant 0 : index
    %c0_115 = arith.constant 0 : index
    %126 = vector.load %arg10[%c0_114, %c0_115] : memref<36x512xf32, #tpu.memory_space<vmem>>, vector<36x512xf32>
    %127 = arith.truncf %126 : vector<36x512xf32> to vector<36x512xbf16>
    %c0_116 = arith.constant 0 : index
    %c0_117 = arith.constant 0 : index
    %128 = vector.load %arg4[%c0_116, %c0_117] : memref<4x36xbf16, #tpu.memory_space<vmem>>, vector<4x36xbf16>
    %cst_118 = arith.constant dense<0.000000e+00> : vector<4x512xf32>
    %129 = tpu.matmul %128, %127, %cst_118 {dimension_numbers = #tpu.dot_dimension_numbers<[1], [0], [0], [1], [0, 0, 1, 1], [], []>} : vector<4x36xbf16>, vector<36x512xbf16>, vector<4x512xf32> -> vector<4x512xf32>
    %cst_119 = arith.constant dense<0.000000e+00> : vector<4xf32>
    %130 = vector.multi_reduction <add>, %129, %cst_119 [1] : vector<4x512xf32> to vector<4xf32>
    %131 = vector.shape_cast %130 : vector<4xf32> to vector<4x1xf32>
    %132 = arith.mulf %129, %129 : vector<4x512xf32>
    %cst_120 = arith.constant dense<0.000000e+00> : vector<4xf32>
    %133 = vector.multi_reduction <add>, %132, %cst_120 [1] : vector<4x512xf32> to vector<4xf32>
    %134 = vector.shape_cast %133 : vector<4xf32> to vector<4x1xf32>
    %cst_121 = arith.constant 0.001953125 : f32
    %135 = vector.broadcast %cst_121 : f32 to vector<4x1xf32>
    %136 = arith.mulf %131, %135 : vector<4x1xf32>
    %cst_122 = arith.constant 0.001953125 : f32
    %137 = vector.broadcast %cst_122 : f32 to vector<4x1xf32>
    %138 = arith.mulf %134, %137 : vector<4x1xf32>
    %139 = arith.mulf %136, %136 : vector<4x1xf32>
    %140 = arith.subf %138, %139 : vector<4x1xf32>
    %c0_123 = arith.constant 0 : index
    %c0_124 = arith.constant 0 : index
    %141 = vector.load %arg5[%c0_123, %c0_124] : memref<4x1xf32, #tpu.memory_space<vmem>>, vector<4x1xf32>
    %cst_125 = arith.constant 9.99999974E-6 : f32
    %142 = vector.broadcast %cst_125 : f32 to vector<4x1xf32>
    %143 = arith.addf %140, %142 : vector<4x1xf32>
    %144 = math.rsqrt %143 : vector<4x1xf32>
    %145 = arith.mulf %141, %144 : vector<4x1xf32>
    %c0_126 = arith.constant 0 : index
    %c0_127 = arith.constant 0 : index
    %146 = vector.load %arg6[%c0_126, %c0_127] : memref<4x1xf32, #tpu.memory_space<vmem>>, vector<4x1xf32>
    %147 = arith.mulf %136, %145 : vector<4x1xf32>
    %148 = arith.subf %146, %147 : vector<4x1xf32>
    %149 = vector.broadcast %145 : vector<4x1xf32> to vector<4x512xf32>
    %150 = arith.mulf %129, %149 : vector<4x512xf32>
    %151 = vector.broadcast %148 : vector<4x1xf32> to vector<4x512xf32>
    %152 = arith.addf %150, %151 : vector<4x512xf32>
    %c0_128 = arith.constant 0 : index
    %c0_129 = arith.constant 0 : index
    %153 = vector.load %arg0[%c0_128, %c0_129] : memref<4x512xf32, #tpu.memory_space<vmem>>, vector<4x512xf32>
    %154 = arith.addf %152, %153 : vector<4x512xf32>
    %cst_130 = arith.constant 0.000000e+00 : f32
    %155 = vector.broadcast %cst_130 : f32 to vector<4x512xf32>
    %156 = arith.maximumf %154, %155 : vector<4x512xf32>
    %c0_131 = arith.constant 0 : index
    %c0_132 = arith.constant 0 : index
    %157 = vector.load %arg8[%c0_131, %c0_132] : memref<4x512xf32, #tpu.memory_space<vmem>>, vector<4x512xf32>
    tpu.vector_store %arg8[%c0_131, %c0_132], %156 {strides = array<i32>} : memref<4x512xf32, #tpu.memory_space<vmem>>, vector<4x512xf32>,
    return
  }
}

</mosaic_0001>

<bundles_post_ra>
// kernel: tpu_custom_call.1
= control target key start
LH: loop header
LB: loop body
LE: loop exit
PB: predicated region body
PF: predicated region fallthrough
CT: control target
= control target key end

     0   :  { %13 = vsyncpa [#allocation5], 0  ;;  %s2508_s0 = inlined_call_operand.vmem [shape: f32[4,512], index: 0, kind: input, shape index: {}]   ;;  %s2509_s1 = inlined_call_operand.vmem [shape: bf16[4,36], index: 1, kind: input, shape index: {}]   ;;  %s2510_s2 = inlined_call_operand.vmem [shape: f32[4,1], index: 2, kind: input, shape index: {}]   ;;  %s2511_s3 = inlined_call_operand.vmem [shape: f32[4,1], index: 3, kind: input, shape index: {}]   ;;  %s2512_s4 = inlined_call_operand.vmem [shape: bf16[4,36], index: 4, kind: input, shape index: {}]   ;;  %s2513_s5 = inlined_call_operand.vmem [shape: f32[4,1], index: 5, kind: input, shape index: {}]   ;;  %s2514_s6 = inlined_call_operand.vmem [shape: f32[4,1], index: 6, kind: input, shape index: {}]   ;;  %s2515_s7 = inlined_call_operand.hbm [shape: f32[9,512], index: 7, kind: input, shape index: {}]   ;;  %s2516_s8 = inlined_call_operand.hbm [shape: f32[4,512], index: 8, kind: output, shape index: {}]  }
   0x1   :  { %14 = vsyncpa [#allocation6], 0  ;;  %s1727_s27 = smov [#allocation4]  }
   0x2   :  { %s34_s28 = sshll.u32 %s1727_s27, 4  ;;  %s35_s28 = int_to_ptr.vmem [resolvable:$true] %s34_s28 }
   0x3   :  { %s1691_s29 = scalar_lea.vmem %s35_s28, 1024  ;;  %p1696_p1 = scmp.lt.s32.totalorder %s35_s28, %s35_s28 }
   0x4   :  { %p1692_p0 = scmp.ne.s32.totalorder %s35_s28, %s1691_s29  ;;  %p1697_p2 = scmp.lt.s32.totalorder %s1691_s29, %s1691_s29 }
   0x6   :  { %p1698_p3 = por %p1697_p2, %p1696_p1 }
   0x8   :  { %p1699_p4 = pnand %p1698_p3, %p1692_p0 }
   0xa   :  { %1702 = shalt.err (!%p1699_p4)
}
   0xb   :  { %s1728_s30 = smov 512   ;;  %s1729_s9 = smov 32  }
   0xc   :  { %40 = dma.hbm_to_vmem [thread:$0]  %s2515_s7, 1024, %s35_s28, [#allocation5], %s1728_s30, %s1728_s30, %s1729_s9  }
   0xd   :  { %1723 = dma.done.wait [#allocation5], 1024  }
   0xe   :  { %1724 = vsyncadd [#allocation5], 4294966272  ;;  %v77_v0 = vlaneseq  ;;  %vm45_vm0 = vcmask 134144   ;;  %v1730_v1 = vmov 0.0   ;;  %vm47_vm1 = vcmask 273544   ;;  %v49_v7 = vld [vmem:[%s2508_s0] sm:$0xff] }
   0xf   :  { %46 = vst.msk [vmem:[#allocation2] sm:$0xf] %vm45_vm0, %v1730_v1  ;;  %v592_v8 = vld [vmem:[#allocation4 + $0x20] ss:$8 sm:$0xf]  ;;  %s1731_s13 = smov 17  }
  0x10   :  { %v78_v2 = vshrl.u32 %v77_v0, 7  ;;  %48 = vst.msk [vmem:[#allocation2 + $0x10] sm:$0xf] %vm47_vm1, %v1730_v1  ;;  %53 = vrot.lane.b32.xlu0 %v49_v7, %s1731_s13  ;;  %v386_v13 = vld [vmem:[#allocation4 + $0x5] ss:$8 sm:$0xf] }
  0x11   :  { %v50_v14 = vld [vmem:[%s2508_s0 + $0x8] sm:$0xff]  ;;  %s1732_s16 = smov 34   ;;  %s1733_s17 = smov 18   ;;  %vm67_vm2 = vcmask 1043592   ;;  %vm68_vm3 = vcmask 1047556   ;;  %vm59_vm4 = vcmask 138240  }
  0x12   :  { %v1798_v3 = vsub.s32 0, %v78_v2  ;;  %v1800_v4 = vsub.s32 1, %v78_v2  ;;  %v1802_v5 = vsub.s32 2, %v78_v2  ;;  %v1804_v6 = vsub.s32 3, %v78_v2  ;;  %s1734_s18 = smov 33   ;;  %s1735_s19 = smov 1   ;;  %vm1862_vm5 = vmor %vm68_vm3, %vm67_vm2 }
  0x13   :  { %v523_v17 = vld [vmem:[#allocation4 + $0x7] ss:$8 sm:$0xf]  ;;  %v319_v25 = vld [vmem:[#allocation4 + $0x4] ss:$8 sm:$0xf] }
  0x14   :  { %v597_v9 = vrot.slane %v592_v8, %v1798_v3  ;;  %v601_v10 = vrot.slane %v592_v8, %v1800_v4  ;;  %v605_v11 = vrot.slane %v592_v8, %v1802_v5  ;;  %v609_v12 = vrot.slane %v592_v8, %v1804_v6  ;;  %55 = vrot.lane.b32.xlu0 %v50_v14, %s1731_s13  ;;  %v455_v32 = vld [vmem:[#allocation4 + $0x6] ss:$8 sm:$0xf]  ;;  %v113_v39 = vld [vmem:[#allocation4 + $0x1] ss:$8 sm:$0xf] }
  0x15   :  { %v391_v15 = vrot.slane %v386_v13, %v1798_v3  ;;  %v395_v16 = vrot.slane %v386_v13, %v1800_v4  ;;  %v399_v20 = vrot.slane %v386_v13, %v1802_v5  ;;  %v403_v21 = vrot.slane %v386_v13, %v1804_v6  ;;  %v250_v46 = vld [vmem:[#allocation4 + $0x3] ss:$8 sm:$0xf]  ;;  %v182_v53 = vld [vmem:[#allocation4 + $0x2] ss:$8 sm:$0xf] }
  0x16   :  { %v610_v18 = vcombine.low %v597_v9, %v601_v10  ;;  %v611_v19 = vcombine.low %v605_v11, %v609_v12  ;;  %v528_v23 = vrot.slane %v523_v17, %v1798_v3  ;;  %v532_v24 = vrot.slane %v523_v17, %v1800_v4  ;;  %s1736_s20 = smov 16   ;;  %s1737_s21 = smov 2   ;;  %v75_v1 = vld [vmem:[#allocation4] ss:$8 sm:$0xf] }
  0x17   :  { %v404_v22 = vcombine.low %v391_v15, %v395_v16  ;;  %v405_v26 = vcombine.low %v399_v20, %v403_v21  ;;  %v536_v27 = vrot.slane %v523_v17, %v1802_v5  ;;  %v540_v28 = vrot.slane %v523_v17, %v1804_v6  ;;  %s1738_s22 = smov 94   ;;  %s1739_s23 = smov 111  }
  0x18   :  { %612 = vrot.lane.b32.xlu1 %v610_v18, %s1732_s16  ;;  %v541_v29 = vcombine.low %v528_v23, %v532_v24  ;;  %v324_v30 = vrot.slane %v319_v25, %v1798_v3  ;;  %v328_v31 = vrot.slane %v319_v25, %v1800_v4  ;;  %v460_v34 = vrot.slane %v455_v32, %v1798_v3  ;;  %s1740_s24 = smov 96   ;;  %s1741_s25 = smov 126  }
  0x19   :  { %406 = vrot.lane.b32.xlu0 %v404_v22, %s1733_s17  ;;  %v542_v33 = vcombine.low %v536_v27, %v540_v28  ;;  %v464_v35 = vrot.slane %v455_v32, %v1800_v4  ;;  %v332_v37 = vrot.slane %v319_v25, %v1802_v5  ;;  %v336_v38 = vrot.slane %v319_v25, %v1804_v6  ;;  %s1742_s26 = smov 110   ;;  %s1743_s27 = smov 95  }
  0x1a   :  { %v337_v36 = vcombine.low %v324_v30, %v328_v31  ;;  %v468_v41 = vrot.slane %v455_v32, %v1802_v5  ;;  %v472_v42 = vrot.slane %v455_v32, %v1804_v6  ;;  %v118_v44 = vrot.slane %v113_v39, %v1798_v3  ;;  %s1744_s28 = smov 127   ;;  %s1745_s29 = smov 112  }
  0x1b   :  { %v473_v40 = vcombine.low %v460_v34, %v464_v35  ;;  %v338_v43 = vcombine.low %v332_v37, %v336_v38  ;;  %v122_v45 = vrot.slane %v113_v39, %v1800_v4  ;;  %v126_v48 = vrot.slane %v113_v39, %v1802_v5 }
  0x1c   :  { %614 = vrot.lane.b32.xlu1 %v611_v19, %s1732_s16  ;;  %v474_v47 = vcombine.low %v468_v41, %v472_v42  ;;  %v130_v49 = vrot.slane %v113_v39, %v1804_v6  ;;  %v255_v51 = vrot.slane %v250_v46, %v1798_v3  ;;  %v259_v52 = vrot.slane %v250_v46, %v1800_v4 }
  0x1d   :  { %543 = vrot.lane.b32.xlu0 %v541_v29, %s1734_s18  ;;  %v131_v50 = vcombine.low %v118_v44, %v122_v45  ;;  %v263_v55 = vrot.slane %v250_v46, %v1802_v5  ;;  %v267_v56 = vrot.slane %v250_v46, %v1804_v6  ;;  %v187_v58 = vrot.slane %v182_v53, %v1798_v3 }
  0x1e   :  { %v132_v54 = vcombine.low %v126_v48, %v130_v49  ;;  %v268_v57 = vcombine.low %v255_v51, %v259_v52  ;;  %v191_v59 = vrot.slane %v182_v53, %v1800_v4  ;;  %v195_v60 = vrot.slane %v182_v53, %v1802_v5 }
  0x1f   :  { %v269_v61 = vcombine.low %v263_v55, %v267_v56  ;;  %v199_v63 = vrot.slane %v182_v53, %v1804_v6  ;;  %v88_v9 = vrot.slane %v75_v1, %v1802_v5  ;;  %v92_v10 = vrot.slane %v75_v1, %v1804_v6 }
  0x20   :  { %408 = vrot.lane.b32.xlu1 %v405_v26, %s1733_s17  ;;  %v200_v62 = vcombine.low %v187_v58, %v191_v59  ;;  %v80_v12 = vrot.slane %v75_v1, %v1798_v3  ;;  %v84_v13 = vrot.slane %v75_v1, %v1800_v4  ;;  %vm61_vm6 = vcmask 1043456  }
  0x21   :  { %339 = vrot.lane.b32.xlu0 %v337_v36, %s1731_s13  ;;  %v201_v0 = vcombine.low %v195_v60, %v199_v63  ;;  %v94_v16 = vcombine.low %v88_v9, %v92_v10  ;;  %vm618_vm7 = vcmask 277504   ;;  %vm208_vm8 = vcmask 15360  }
  0x22   :  { %v93_v19 = vcombine.low %v80_v12, %v84_v13  ;;  %vm412_vm9 = vcmask 146432   ;;  %vm549_vm10 = vcmask 269312   ;;  %vm481_vm11 = vcmask 261120  }
  0x23   :  { %vm2520_vm12 = vcmask 7168   ;;  %vm2519_vm13 = vcmask 130048   ;;  %vm2517_vm14 = vcmask 900096   ;;  %vm2518_vm15 = vcmask 777216  }
  0x24   :  { %545 = vrot.lane.b32.xlu1 %v542_v33, %s1734_s18  ;;  %vm165_vm1 = vcmask 1039360   ;;  %vm643_vm2 = vcmask 769024   ;;  %vm369_vm3 = vcmask 908288  }
  0x25   :  { %341 = vrot.lane.b32.xlu0 %v338_v43, %s1731_s13 }
  0x28   :  { %475 = vrot.lane.b32.xlu1 %v473_v40, %s1729_s9 }
  0x29   :  { %133 = vrot.lane.b32.xlu0 %v131_v50, %s1735_s19 }
  0x2c   :  { %477 = vrot.lane.b32.xlu1 %v474_v47, %s1729_s9 }
  0x2d   :  { %270 = vrot.lane.b32.xlu0 %v268_v57, %s1736_s20 }
  0x30   :  { %135 = vrot.lane.b32.xlu1 %v132_v54, %s1735_s19 }
  0x31   :  { %202 = vrot.lane.b32.xlu0 %v200_v62, %s1737_s21 }
  0x34   :  { %272 = vrot.lane.b32.xlu1 %v269_v61, %s1736_s20 }
  0x38   :  { %204 = vrot.lane.b32.xlu1 %v201_v0, %s1737_s21 }
  0x82   :  { %v54_v2 = vpop.permute.xlu0 %53 }
  0x83   :  { %v57_v8 = vrot.slane %v54_v2, 4 }
  0x85   :  { %v60_v11 = vsel %vm59_vm4, %v57_v8, %v54_v2 }
  0x86   :  { %70 = vst.msk [vmem:[#allocation2] sm:$0xff] %vm1862_vm5, %v60_v11  ;;  %v56_v15 = vpop.permute.xlu0 %55 }
  0x87   :  { %v58_v17 = vrot.slane %v56_v15, 4 }
  0x89   :  { %v62_v18 = vsel %vm61_vm6, %v57_v8, %v58_v17  ;;  %72 = vst.msk [vmem:[#allocation2 + $0x10] sm:$0xf] %vm45_vm0, %v58_v17 }
  0x8a   :  { %v613_v14 = vpop.permute.xlu1 %612  ;;  %v1876_v20 = vsel %vm59_vm4, %v62_v18, %v56_v15 }
  0x8b   :  { %v1878_v22 = vpop.permute.xlu0 %406  ;;  %v98_v23 = vmul.f32 %v94_v16, %v1876_v20  ;;  %v616_v44 = vrot.slane %v613_v14, 4 }
  0x8c   :  { %v410_v60 = vrot.slane %v1878_v22, 4 }
  0x8d   :  { %v1881_v24 = vld [vmem:[#allocation2] sm:$0xff]  ;;  %v102_v25 = vcombine.high %v98_v23, %v98_v23  ;;  %107 = vst [vmem:[#allocation3 + $0x50] sm:$0xf] %v98_v23  ;;  %v619_v48 = vsel %vm618_vm7, %v616_v44, %v613_v14 }
  0x8e   :  { %v615_v21 = vpop.permute.xlu1 %614  ;;  %v97_v26 = vmul.f32 %v93_v19, %v1881_v24  ;;  %v1905_v49 = vmul.f32 %v619_v48, %v1881_v24  ;;  %v413_v0 = vsel %vm412_vm9, %v410_v60, %v1878_v22 }
  0x8f   :  { %v1886_v28 = vpop.permute.xlu0 %543  ;;  %108 = vst [vmem:[#allocation3 + $0x18] sm:$0xf] %v102_v25  ;;  %v617_v29 = vrot.slane %v615_v21, 4  ;;  %v419_v11 = vmul.f32 %v413_v0, %v1881_v24 }
  0x90   :  { %105 = vst [vmem:[#allocation3] sm:$0xf] %v97_v26  ;;  %v590_v30 = vld [vmem:[#allocation2 + $0x10] sm:$0xf]  ;;  %v101_v31 = vcombine.high %v97_v26, %v97_v26  ;;  %v547_v9 = vrot.slane %v1886_v28, 4 }
  0x91   :  { %v627_v32 = vmul.f32 %v617_v29, %v590_v30  ;;  %v317_v37 = vld [vmem:[#allocation2 + $0x10] sm:$0xf]  ;;  %v620_v53 = vsel %vm61_vm6, %v616_v44, %v617_v29 }
  0x92   :  { %v1884_v27 = vpop.permute.xlu1 %408  ;;  %106 = vst [vmem:[#allocation3 + $0x38] sm:$0xf] %v101_v31  ;;  %v453_v42 = vld [vmem:[#allocation2 + $0x10] sm:$0xf]  ;;  %v621_v58 = vsel %vm618_vm7, %v620_v53, %v615_v21  ;;  %v550_v12 = vsel %vm549_vm10, %v547_v9, %v1886_v28  ;;  %v425_v53 = vcombine.low %v419_v11, %v419_v11 }
  0x93   :  { %v1890_v34 = vpop.permute.xlu0 %339  ;;  %641 = vrot.lane.b32.xlu0 %v627_v32, %s1738_s22  ;;  %v180_v62 = vld [vmem:[#allocation2 + $0x10] sm:$0xf]  ;;  %v1926_v2 = vmul.f32 %v621_v58, %v1876_v20  ;;  %v411_v16 = vrot.slane %v1884_v27, 4  ;;  %v556_v17 = vmul.f32 %v550_v12, %v1881_v24 }
  0x94   :  { %v343_v54 = vrot.slane %v1890_v34, 4  ;;  %v384_v21 = vld [vmem:[#allocation2 + $0x10] sm:$0xf] }
  0x95   :  { %v421_v25 = vmul.f32 %v411_v16, %v384_v21  ;;  %v521_v31 = vld [vmem:[#allocation2 + $0x10] sm:$0xf]  ;;  %v414_v44 = vsel %vm61_vm6, %v410_v60, %v411_v16  ;;  %v631_v60 = vcombine.high %v1905_v49, %v1905_v49 }
  0x96   :  { %v1888_v33 = vpop.permute.xlu1 %545  ;;  %v345_v18 = vsel %vm59_vm4, %v343_v54, %v1890_v34  ;;  %v415_v48 = vsel %vm412_vm9, %v414_v44, %v1884_v27 }
  0x97   :  { %v342_v36 = vpop.permute.xlu0 %341  ;;  %v351_v23 = vmul.f32 %v345_v18, %v1881_v24  ;;  %v548_v26 = vrot.slane %v1888_v33, 4 }
  0x98   :  { %v344_v38 = vrot.slane %v342_v36, 4 }
  0x9a   :  { %v1893_v35 = vpop.permute.xlu1 %475  ;;  %v353_v39 = vmul.f32 %v344_v38, %v317_v37  ;;  %v346_v61 = vsel %vm61_vm6, %v343_v54, %v344_v38  ;;  %v427_v37 = vcombine.low %v421_v25, %v421_v25  ;;  %v558_v38 = vmul.f32 %v548_v26, %v521_v31  ;;  %v111_v54 = vld [vmem:[#allocation2 + $0x10] sm:$0xf] }
  0x9b   :  { %v1895_v41 = vpop.permute.xlu0 %133  ;;  %v479_v1 = vrot.slane %v1893_v35, 4  ;;  %v347_v8 = vsel %vm59_vm4, %v346_v61, %v342_v36 }
  0x9c   :  { %367 = vrot.lane.b32.xlu0 %v353_v39, %s1739_s23  ;;  %v1938_v13 = vmul.f32 %v347_v8, %v1876_v20  ;;  %v137_v29 = vrot.slane %v1895_v41, 4 }
  0x9d   :  { %v482_v28 = vsel %vm481_vm11, %v479_v1, %v1893_v35 }
  0x9e   :  { %v478_v40 = vpop.permute.xlu1 %477  ;;  %v488_v34 = vmul.f32 %v482_v28, %v1881_v24  ;;  %v140_v36 = vsel %vm2520_vm12, %v137_v29, %v1895_v41  ;;  %v358_v12 = vcombine.high %v1938_v13, %v1938_v13 }
  0x9f   :  { %v480_v43 = vrot.slane %v478_v40, 4  ;;  %v1900_v47 = vpop.permute.xlu0 %270 }
  0xa0   :  { %v274_v35 = vrot.slane %v1900_v47, 4  ;;  %v494_v8 = vcombine.high %v488_v34, %v488_v34 }
  0xa1   :  { %v490_v45 = vmul.f32 %v480_v43, %v453_v42  ;;  %v483_v10 = vsel %vm61_vm6, %v479_v1, %v480_v43  ;;  %v564_v43 = vcombine.low %v558_v38, %v558_v38 }
  0xa2   :  { %v1898_v46 = vpop.permute.xlu1 %135  ;;  %v484_v14 = vsel %vm481_vm11, %v483_v10, %v478_v40  ;;  %v146_v40 = vmul.f32 %v140_v36, %v1881_v24  ;;  %v277_v42 = vsel %vm2519_vm13, %v274_v35, %v1900_v47  ;;  %v551_v47 = vsel %vm61_vm6, %v547_v9, %v548_v26 }
  0xa3   :  { %504 = vrot.lane.b32.xlu0 %v490_v45, %s1740_s24  ;;  %v203_v51 = vpop.permute.xlu0 %202  ;;  %v1950_v19 = vmul.f32 %v484_v14, %v1876_v20  ;;  %v138_v32 = vrot.slane %v1898_v46, 4  ;;  %v283_v45 = vmul.f32 %v277_v42, %v1881_v24  ;;  %v248_v14 = vld [vmem:[#allocation2 + $0x10] sm:$0xf] }
  0xa4   :  { %v206_v52 = vrot.slane %v203_v51, 4 }
  0xa5   :  { %v141_v39 = vsel %vm61_vm6, %v137_v29, %v138_v32  ;;  %v148_v27 = vmul.f32 %v138_v32, %v111_v54  ;;  %v289_v10 = vcombine.low %v283_v45, %v283_v45 }
  0xa6   :  { %v1907_v50 = vpop.permute.xlu1 %272  ;;  %v209_v55 = vsel %vm208_vm8, %v206_v52, %v203_v51  ;;  %v142_v41 = vsel %vm2520_vm12, %v141_v39, %v1898_v46  ;;  %v420_v46 = vmul.f32 %v415_v48, %v1876_v20  ;;  %vm2521_vm12 = vcmask 1031168  }
  0xa7   :  { %633 = vrot.lane.b32.xlu0 %v1905_v49, %s1738_s22  ;;  %v1915_v57 = vmul.f32 %v209_v55, %v1881_v24  ;;  %v147_v51 = vmul.f32 %v142_v41, %v1876_v20  ;;  %v562_v55 = vcombine.low %v556_v17, %v556_v17  ;;  %v154_v58 = vcombine.low %v148_v27, %v148_v27 }
  0xa9   :  { %v153_v1 = vcombine.low %v147_v51, %v147_v51  ;;  %v221_v49 = vcombine.high %v1915_v57, %v1915_v57 }
  0xaa   :  { %v205_v56 = vpop.permute.xlu1 %204 }
  0xab   :  { %v207_v59 = vrot.slane %v205_v56, 4  ;;  %223 = vrot.lane.b32.xlu0 %v1915_v57, %s1741_s25  ;;  %v1746_v57 = vmov 0  }
  0xac   :  { %738 = vmatprep.mubr.bf16.mxu0 %v1746_v57  ;;  %779 = vmatprep.mubr.bf16.mxu1 %v1746_v57 }
  0xad   :  { %v217_v63 = vmul.f32 %v207_v59, %v180_v62  ;;  %v210_v15 = vsel %vm61_vm6, %v206_v52, %v207_v59  ;;  %v552_v52 = vsel %vm549_vm10, %v551_v47, %v1888_v33  ;;  %v426_v59 = vcombine.low %v420_v46, %v420_v46  ;;  %1675 = vset.pattern.permute.xlu0 %v1746_v57 }
  0xae   :  { %v211_v22 = vsel %vm208_vm8, %v210_v15, %v205_v56  ;;  %v557_v24 = vmul.f32 %v552_v52, %v1876_v20  ;;  %v275_v56 = vrot.slane %v1907_v50, 4  ;;  %1676 = vset.pattern.permute.xlu1 %v1746_v57 }
  0xaf   :  { %231 = vrot.lane.b32.xlu1 %v217_v63, %s1741_s25  ;;  %637 = vrot.lane.b32.xlu0 %v1926_v2, %s1738_s22  ;;  %v1962_v30 = vmul.f32 %v211_v22, %v1876_v20  ;;  %v357_v63 = vcombine.high %v351_v23, %v351_v23 }
  0xb0   :  { %v278_v33 = vsel %vm61_vm6, %v274_v35, %v275_v56  ;;  %v563_v61 = vcombine.low %v557_v24, %v557_v24  ;;  %v285_v15 = vmul.f32 %v275_v56, %v248_v14 }
  0xb1   :  { %v279_v62 = vsel %vm2519_vm13, %v278_v33, %v1907_v50  ;;  %v222_v50 = vcombine.high %v1962_v30, %v1962_v30  ;;  %vm693_vm13 = vcmask 1041408  }
  0xb2   :  { %v284_v0 = vmul.f32 %v279_v62, %v1876_v20  ;;  %v152_v20 = vcombine.low %v146_v40, %v146_v40  ;;  %v291_v16 = vcombine.low %v285_v15, %v285_v15 }
  0xb3   :  { %430 = vrot.lane.b32.xlu1 %v419_v11, %s1742_s26  ;;  %363 = vrot.lane.b32.xlu0 %v1938_v13, %s1739_s23  ;;  %v632_v11 = vcombine.high %v1926_v2, %v1926_v2  ;;  %v495_v2 = vcombine.high %v1950_v19, %v1950_v19 }
  0xb4   :  { %v290_v9 = vcombine.low %v284_v0, %v284_v0 }
  0xb7   :  { %567 = vrot.lane.b32.xlu1 %v556_v17, %s1743_s27  ;;  %500 = vrot.lane.b32.xlu0 %v1950_v19, %s1740_s24 }
  0xbb   :  { %359 = vrot.lane.b32.xlu1 %v351_v23, %s1739_s23  ;;  %227 = vrot.lane.b32.xlu0 %v1962_v30, %s1741_s25 }
  0xbf   :  { %496 = vrot.lane.b32.xlu1 %v488_v34, %s1740_s24  ;;  %436 = vrot.lane.b32.xlu0 %v427_v37, %s1742_s26 }
  0xc3   :  { %157 = vrot.lane.b32.xlu1 %v146_v40, %s1744_s28  ;;  %573 = vrot.lane.b32.xlu0 %v564_v43, %s1743_s27 }
  0xc7   :  { %294 = vrot.lane.b32.xlu1 %v283_v45, %s1745_s29  ;;  %161 = vrot.lane.b32.xlu0 %v147_v51, %s1744_s28 }
  0xcb   :  { %434 = vrot.lane.b32.xlu1 %v420_v46, %s1742_s26  ;;  %428 = vrot.lane.b32.xlu0 %v425_v53, %s1742_s26 }
  0xcf   :  { %571 = vrot.lane.b32.xlu1 %v557_v24, %s1743_s27  ;;  %565 = vrot.lane.b32.xlu0 %v562_v55, %s1743_s27 }
  0xd3   :  { %163 = vrot.lane.b32.xlu1 %v154_v58, %s1744_s28  ;;  %432 = vrot.lane.b32.xlu0 %v426_v59, %s1742_s26 }
  0xd7   :  { %635 = vrot.lane.b32.xlu1 %v631_v60, %s1738_s22  ;;  %569 = vrot.lane.b32.xlu0 %v563_v61, %s1743_s27 }
  0xdb   :  { %361 = vrot.lane.b32.xlu1 %v357_v63, %s1739_s23  ;;  %159 = vrot.lane.b32.xlu0 %v153_v1, %s1744_s28 }
  0xdf   :  { %498 = vrot.lane.b32.xlu1 %v494_v8, %s1740_s24  ;;  %296 = vrot.lane.b32.xlu0 %v290_v9, %s1745_s29 }
  0xe3   :  { %225 = vrot.lane.b32.xlu1 %v221_v49, %s1741_s25  ;;  %229 = vrot.lane.b32.xlu0 %v222_v50, %s1741_s25 }
  0xe7   :  { %155 = vrot.lane.b32.xlu1 %v152_v20, %s1744_s28  ;;  %298 = vrot.lane.b32.xlu0 %v284_v0, %s1745_s29 }
  0xeb   :  { %292 = vrot.lane.b32.xlu1 %v289_v10, %s1745_s29 }
  0xef   :  { %639 = vrot.lane.b32.xlu1 %v632_v11, %s1738_s22 }
  0xf3   :  { %365 = vrot.lane.b32.xlu1 %v358_v12, %s1739_s23 }
  0xf7   :  { %502 = vrot.lane.b32.xlu1 %v495_v2, %s1740_s24 }
  0xfb   :  { %300 = vrot.lane.b32.xlu1 %v291_v16, %s1745_s29 }
 0x105   :  { %v2036_v17 = vpop.permute.xlu0 %641 }
 0x10e   :  { %v2038_v18 = vpop.permute.xlu0 %367 }
 0x115   :  { %v2040_v13 = vpop.permute.xlu0 %504 }
 0x119   :  { %v634_v21 = vpop.permute.xlu0 %633 }
 0x11d   :  { %v2042_v22 = vpop.permute.xlu0 %223 }
 0x121   :  { %v2044_v23 = vpop.permute.xlu1 %231  ;;  %v2046_v25 = vpop.permute.xlu0 %637 }
 0x125   :  { %v431_v19 = vpop.permute.xlu1 %430  ;;  %v2048_v26 = vpop.permute.xlu0 %363 }
 0x129   :  { %v568_v28 = vpop.permute.xlu1 %567  ;;  %v2050_v29 = vpop.permute.xlu0 %500 }
 0x12d   :  { %v360_v30 = vpop.permute.xlu1 %359  ;;  %v2052_v31 = vpop.permute.xlu0 %227 }
 0x131   :  { %v497_v32 = vpop.permute.xlu1 %496  ;;  %v437_v34 = vpop.permute.xlu0 %436 }
 0x135   :  { %v2054_v36 = vpop.permute.xlu1 %157  ;;  %v574_v35 = vpop.permute.xlu0 %573 }
 0x139   :  { %v2056_v37 = vpop.permute.xlu1 %294  ;;  %v162_v38 = vpop.permute.xlu0 %161 }
 0x13d   :  { %v435_v39 = vpop.permute.xlu1 %434  ;;  %v429_v42 = vpop.permute.xlu0 %428 }
 0x13e   :  { %v442_v40 = vsel %vm2517_vm14, %v435_v39, %v437_v34  ;;  %v439_v43 = vsel %vm2517_vm14, %v429_v42, %v431_v19 }
 0x13f   :  { %450 = vst [vmem:[#allocation3 + $0x40] sm:$0xf0] %v442_v40  ;;  %447 = vst [vmem:[#allocation3 + $0x8] sm:$0xf0] %v439_v43 }
 0x141   :  { %v572_v44 = vpop.permute.xlu1 %571  ;;  %v566_v45 = vpop.permute.xlu0 %565 }
 0x142   :  { %v579_v41 = vsel %vm2518_vm15, %v572_v44, %v574_v35  ;;  %v576_v48 = vsel %vm2518_vm15, %v566_v45, %v568_v28 }
 0x143   :  { %587 = vst [vmem:[#allocation3 + $0x60] sm:$0xf0] %v579_v41  ;;  %584 = vst [vmem:[#allocation3 + $0x58] sm:$0xf0] %v576_v48 }
 0x145   :  { %v164_v51 = vpop.permute.xlu1 %163  ;;  %v433_v46 = vpop.permute.xlu0 %432 }
 0x146   :  { %v169_v47 = vsel %vm165_vm1, %v162_v38, %v164_v51  ;;  %v440_v52 = vsel %vm2517_vm14, %v431_v19, %v433_v46  ;;  %v441_v53 = vsel %vm2517_vm14, %v433_v46, %v435_v39  ;;  %vm506_vm14 = vcmask 785408  }
 0x147   :  { %177 = vst [vmem:[#allocation3 + $0x18] sm:$0xf0] %v169_v47  ;;  %448 = vst [vmem:[#allocation3 + $0x88] sm:$0xf0] %v440_v52 }
 0x148   :  { %449 = vst [vmem:[#allocation3 + $0x28] sm:$0xf0] %v441_v53 }
 0x149   :  { %v636_v54 = vpop.permute.xlu1 %635  ;;  %v570_v55 = vpop.permute.xlu0 %569 }
 0x14a   :  { %v644_v24 = vsel %vm643_vm2, %v634_v21, %v636_v54  ;;  %v645_v27 = vsel %vm643_vm2, %v636_v54, %v2046_v25  ;;  %v577_v56 = vsel %vm2518_vm15, %v568_v28, %v570_v55  ;;  %v578_v58 = vsel %vm2518_vm15, %v570_v55, %v572_v44 }
 0x14b   :  { %652 = vst [vmem:[#allocation3 + $0x20] sm:$0xf] %v644_v24  ;;  %653 = vst [vmem:[#allocation3 + $0x48] sm:$0xf] %v645_v27  ;;  %vm302_vm15 = vcmask 916480  }
 0x14c   :  { %585 = vst [vmem:[#allocation3 + $0x10] sm:$0xf0] %v577_v56  ;;  %586 = vst [vmem:[#allocation3 + $0x98] sm:$0xf0] %v578_v58 }
 0x14d   :  { %v362_v59 = vpop.permute.xlu1 %361  ;;  %v160_v61 = vpop.permute.xlu0 %159 }
 0x14e   :  { %v370_v33 = vsel %vm369_vm3, %v360_v30, %v362_v59  ;;  %v371_v60 = vsel %vm369_vm3, %v362_v59, %v2048_v26  ;;  %v167_v62 = vsel %vm165_vm1, %v2054_v36, %v160_v61  ;;  %v168_v63 = vsel %vm165_vm1, %v160_v61, %v162_v38 }
 0x14f   :  { %378 = vst [vmem:[#allocation3 + $0x8] sm:$0xf] %v370_v33  ;;  %379 = vst [vmem:[#allocation3 + $0x88] sm:$0xf] %v371_v60 }
 0x150   :  { %175 = vst [vmem:[#allocation3 + $0x38] sm:$0xf0] %v167_v62  ;;  %176 = vst [vmem:[#allocation3 + $0x50] sm:$0xf0] %v168_v63 }
 0x151   :  { %v499_v0 = vpop.permute.xlu1 %498  ;;  %v297_v9 = vpop.permute.xlu0 %296 }
 0x152   :  { %v507_v1 = vsel %vm506_vm14, %v497_v32, %v499_v0  ;;  %v508_v8 = vsel %vm506_vm14, %v499_v0, %v2050_v29  ;;  %v673_v49 = vld [vmem:[#allocation3 + $0x48] sm:$0xf]  ;;  %v672_v50 = vld [vmem:[#allocation3 + $0x20] sm:$0xf]  ;;  %v304_v20 = vsel %vm302_vm15, %v2056_v37, %v297_v9  ;;  %v659_v0 = vld [vmem:[#allocation3 + $0x18] sm:$0xff] }
 0x153   :  { %515 = vst [vmem:[#allocation3 + $0x58] sm:$0xf] %v507_v1  ;;  %516 = vst [vmem:[#allocation3 + $0x10] sm:$0xf] %v508_v8  ;;  %v685_v10 = vpack.c.bf16 %v673_v49, %v673_v49  ;;  %v684_v11 = vpack.c.bf16 %v672_v50, %v672_v50 }
 0x154   :  { %312 = vst [vmem:[#allocation3 + $0x68] sm:$0xf0] %v304_v20 }
 0x155   :  { %1646 = vmatprep.subr.msk.bf16.mxu0 %vm693_vm13, %v685_v10  ;;  %v226_v12 = vpop.permute.xlu1 %225  ;;  %v695_v14 = vsel %vm693_vm13, %v684_v11, 0  ;;  %v230_v16 = vpop.permute.xlu0 %229 }
 0x156   :  { %v234_v2 = vsel %vm2521_vm12, %v2042_v22, %v226_v12  ;;  %v235_v15 = vsel %vm2521_vm12, %v226_v12, %v2052_v31  ;;  %717 = vmatpush1.bf16.msra.mxu0 %v695_v14  ;;  %v236_v21 = vsel %vm2521_vm12, %v2052_v31, %v230_v16  ;;  %v237_v19 = vsel %vm2521_vm12, %v230_v16, %v2044_v23  ;;  %v665_v30 = vld [vmem:[#allocation3 + $0x88] sm:$0xff] }
 0x157   :  { %242 = vst [vmem:[#allocation3 + $0x30] sm:$0xf] %v234_v2  ;;  %243 = vst [vmem:[#allocation3 + $0x68] sm:$0xf] %v235_v15  ;;  %v664_v35 = vld [vmem:[#allocation3 + $0x8] sm:$0xff]  ;;  %v657_v43 = vld [vmem:[#allocation3 + $0x38] sm:$0xff] }
 0x158   :  { %244 = vst [vmem:[#allocation3 + $0x78] sm:$0xf] %v236_v21  ;;  %245 = vst [vmem:[#allocation3 + $0x80] sm:$0xf] %v237_v19  ;;  %vm689_vm12 = vcmask 293888  }
 0x159   :  { %v156_v28 = vpop.permute.xlu1 %155  ;;  %v299_v32 = vpop.permute.xlu0 %298 }
 0x15a   :  { %v166_v22 = vsel %vm165_vm1, %v156_v28, %v2054_v36  ;;  %v669_v34 = vld [vmem:[#allocation3 + $0x10] sm:$0xff]  ;;  %v668_v38 = vld [vmem:[#allocation3 + $0x58] sm:$0xff]  ;;  %v305_v39 = vsel %vm302_vm15, %v297_v9, %v299_v32 }
 0x15b   :  { %174 = vst [vmem:[#allocation3] sm:$0xf0] %v166_v22  ;;  %v681_v40 = vpack.c.bf16 %v669_v34, %v665_v30  ;;  %v680_v42 = vpack.c.bf16 %v668_v38, %v664_v35  ;;  %313 = vst [vmem:[#allocation3 + $0x78] sm:$0xf0] %v305_v39  ;;  %v658_v9 = vld [vmem:[#allocation3 + $0x50] sm:$0xff] }
 0x15d   :  { %718 = vmatprep.subr.bf16.mxu0 %v681_v40  ;;  %v293_v31 = vpop.permute.xlu1 %292 }
 0x15e   :  { %v303_v23 = vsel %vm302_vm15, %v293_v31, %v2056_v37  ;;  %719 = vmatpush1.bf16.msra.mxu0 %v680_v42  ;;  %v661_v44 = vld [vmem:[#allocation3 + $0x68] sm:$0xff] }
 0x15f   :  { %311 = vst [vmem:[#allocation3 + $0x30] sm:$0xf0] %v303_v23  ;;  %v677_v36 = vpack.c.bf16 %v661_v44, %v657_v43 }
 0x161   :  { %v640_v41 = vpop.permute.xlu1 %639  ;;  %720 = vmatprep.subr.bf16.mxu0 %v677_v36 }
 0x162   :  { %v646_v45 = vsel %vm643_vm2, %v2046_v25, %v640_v41  ;;  %v647_v48 = vsel %vm643_vm2, %v640_v41, %v2036_v17  ;;  %v656_v46 = vld [vmem:[#allocation3] sm:$0xff]  ;;  %v688_v17 = vld [vmem:[%s2509_s1] sm:$0x3]  ;;  %v662_v63 = vld [vmem:[#allocation3 + $0x78] sm:$0xff] }
 0x163   :  { %654 = vst [vmem:[#allocation3 + $0x70] sm:$0xf] %v646_v45  ;;  %655 = vst [vmem:[#allocation3 + $0x90] sm:$0xf] %v647_v48  ;;  %v678_v49 = vpack.c.bf16 %v662_v63, %v658_v9 }
 0x165   :  { %v366_v51 = vpop.permute.xlu1 %365 }
 0x166   :  { %v372_v47 = vsel %vm369_vm3, %v2048_v26, %v366_v51  ;;  %v373_v37 = vsel %vm369_vm3, %v366_v51, %v2038_v18  ;;  %v660_v52 = vld [vmem:[#allocation3 + $0x30] sm:$0xff] }
 0x167   :  { %380 = vst [vmem:[#allocation3 + $0x28] sm:$0xf] %v372_v47  ;;  %381 = vst [vmem:[#allocation3 + $0x40] sm:$0xf] %v373_v37  ;;  %v676_v53 = vpack.c.bf16 %v660_v52, %v656_v46  ;;  %v814_v52 = vld [vmem:[%s2510_s2] sm:$0xf] }
 0x168   :  { %v1296_v46 = vld [vmem:[#allocation4 + $0x7] ss:$8 sm:$0xf] }
 0x169   :  { %v503_v54 = vpop.permute.xlu1 %502  ;;  %721 = vmatpush1.bf16.msra.mxu0 %v676_v53  ;;  %v1362_v53 = vld [vmem:[#allocation4 + $0x20] ss:$8 sm:$0xf] }
 0x16a   :  { %v509_v25 = vsel %vm506_vm14, %v2050_v29, %v503_v54  ;;  %v510_v26 = vsel %vm506_vm14, %v503_v54, %v2040_v13  ;;  %v675_v24 = vld [vmem:[#allocation3 + $0x90] sm:$0xf]  ;;  %v1301_v54 = vrot.slane %v1296_v46, %v1798_v3 }
 0x16b   :  { %v674_v18 = vld [vmem:[#allocation3 + $0x70] sm:$0xf]  ;;  %517 = vst [vmem:[#allocation3 + $0x98] sm:$0xf] %v509_v25  ;;  %518 = vst [vmem:[#allocation3 + $0x60] sm:$0xf] %v510_v26  ;;  %v687_v27 = vpack.c.bf16 %v675_v24, %v675_v24 }
 0x16c   :  { %v686_v55 = vpack.c.bf16 %v674_v18, %v674_v18  ;;  %1647 = vmatmul.mubr.msk.bf16.vlgmr.msra.gmra.mxu0 %vm689_vm12, %v688_v17  ;;  %v1100_v26 = vld [vmem:[#allocation4 + $0x4] ss:$8 sm:$0xf] }
 0x16d   :  { %1648 = vmatprep.subr.msk.bf16.mxu1 %vm693_vm13, %v687_v27  ;;  %v301_v56 = vpop.permute.xlu1 %300  ;;  %1504 = vmatprep.mubr.bf16.mxu0 %v1746_v57  ;;  %v818_v18 = vld [vmem:[%s2511_s3] sm:$0xf]  ;;  %v1367_v27 = vrot.slane %v1362_v53, %v1798_v3 }
 0x16e   :  { %v701_v58 = vsel %vm693_vm13, %v686_v55, 0  ;;  %v306_v29 = vsel %vm302_vm15, %v299_v32, %v301_v56  ;;  %v667_v13 = vld [vmem:[#allocation3 + $0x40] sm:$0xff]  ;;  %v666_v33 = vld [vmem:[#allocation3 + $0x28] sm:$0xff]  ;;  %v1371_v55 = vrot.slane %v1362_v53, %v1800_v4 }
 0x16f   :  { %758 = vmatpush1.bf16.msra.mxu1 %v701_v58  ;;  %314 = vst [vmem:[#allocation3 + $0x80] sm:$0xf0] %v306_v29  ;;  %v1105_v29 = vrot.slane %v1100_v26, %v1798_v3 }
 0x172   :  { %v671_v59 = vld [vmem:[#allocation3 + $0x60] sm:$0xff]  ;;  %v670_v60 = vld [vmem:[#allocation3 + $0x98] sm:$0xff] }
 0x173   :  { %v683_v61 = vpack.c.bf16 %v671_v59, %v667_v13  ;;  %v682_v62 = vpack.c.bf16 %v670_v60, %v666_v33  ;;  %v1109_v13 = vrot.slane %v1100_v26, %v1800_v4  ;;  %v1380_v33 = vcombine.low %v1367_v27, %v1371_v55 }
 0x174   :  { %v1375_v60 = vrot.slane %v1362_v53, %v1802_v5 }
 0x175   :  { %759 = vmatprep.subr.bf16.mxu1 %v683_v61  ;;  %v1379_v61 = vrot.slane %v1362_v53, %v1804_v6  ;;  %v1118_v63 = vcombine.low %v1105_v29, %v1109_v13 }
 0x176   :  { %760 = vmatpush1.bf16.msra.mxu1 %v682_v62  ;;  %v663_v1 = vld [vmem:[#allocation3 + $0x80] sm:$0xff] }
 0x177   :  { %v679_v8 = vpack.c.bf16 %v663_v1, %v659_v0  ;;  %v1165_v62 = vld [vmem:[#allocation4 + $0x5] ss:$8 sm:$0xf]  ;;  %v1113_v0 = vrot.slane %v1100_v26, %v1802_v5  ;;  %v1117_v1 = vrot.slane %v1100_v26, %v1804_v6  ;;  %v1381_v9 = vcombine.low %v1375_v60, %v1379_v61 }
 0x179   :  { %761 = vmatprep.subr.bf16.mxu1 %v679_v8  ;;  %v903_v8 = vld [vmem:[#allocation4 + $0x1] ss:$8 sm:$0xf] }
 0x17a   :  { %762 = vmatpush1.bf16.msra.mxu1 %v678_v49  ;;  %v1170_v49 = vrot.slane %v1165_v62, %v1798_v3 }
 0x17d   :  { %1649 = vmatmul.mubr.msk.bf16.vlgmr.msra.gmra.mxu1 %vm689_vm12, %v688_v17  ;;  %v1305_v17 = vrot.slane %v1296_v46, %v1800_v4 }
 0x17e   :  { %1545 = vmatprep.mubr.bf16.mxu1 %v1746_v57 }
 0x17f   :  { %v1314_v58 = vcombine.low %v1301_v54, %v1305_v17 }
 0x22c   :  { %v2118_v50 = vpop.f32.mrf.mxu0 }
 0x22d   :  { %v797_v12 = vmul.f32 %v2118_v50, %v2118_v50  ;;  %v788_v2 = vsel %vm61_vm6, %v2118_v50, 0.0 }
 0x22e   :  { %v2120_v20 = vpop.f32.mrf.mxu0 }
 0x22f   :  { %v798_v14 = vmul.f32 %v2120_v20, %v2120_v20  ;;  %v789_v15 = vsel %vm61_vm6, %v2120_v20, 0.0  ;;  %v801_v57 = vsel %vm61_vm6, %v797_v12, 0.0  ;;  %v908_v12 = vrot.slane %v903_v8, %v1798_v3 }
 0x230   :  { %v744_v10 = vpop.f32.mrf.mxu0  ;;  %v790_v21 = vadd.f32 %v789_v15, %v788_v2  ;;  %v1034_v2 = vld [vmem:[#allocation4 + $0x3] ss:$8 sm:$0xf] }
 0x231   :  { %v802_v16 = vsel %vm61_vm6, %v798_v14, 0.0  ;;  %v1174_v10 = vrot.slane %v1165_v62, %v1800_v4  ;;  %v912_v14 = vrot.slane %v903_v8, %v1800_v4  ;;  %v1051_v53 = vrot.slane %v1034_v2, %v1804_v6 }
 0x232   :  { %v745_v11 = vpop.f32.mrf.mxu0  ;;  %v803_v34 = vadd.f32 %v802_v16, %v801_v57  ;;  %v1178_v57 = vrot.slane %v1165_v62, %v1802_v5  ;;  %v1182_v16 = vrot.slane %v1165_v62, %v1804_v6 }
 0x233   :  { %v1119_v11 = vcombine.low %v1113_v0, %v1117_v1  ;;  %v1183_v15 = vcombine.low %v1170_v49, %v1174_v10 }
 0x23d   :  { %v2132_v19 = vpop.f32.mrf.mxu1 }
 0x23e   :  { %v791_v28 = vsel %vm61_vm6, %v2132_v19, 0.0  ;;  %v799_v30 = vmul.f32 %v2132_v19, %v2132_v19 }
 0x23f   :  { %v2138_v22 = vpop.f32.mrf.mxu1  ;;  %v792_v32 = vadd.f32 %v791_v28, %v790_v21  ;;  %v921_v21 = vcombine.low %v908_v12, %v912_v14  ;;  %v1039_v28 = vrot.slane %v1034_v2, %v1798_v3 }
 0x240   :  { %v800_v35 = vmul.f32 %v2138_v22, %v2138_v22  ;;  %v793_v38 = vsel %vm61_vm6, %v2138_v22, 0.0  ;;  %v804_v39 = vsel %vm61_vm6, %v799_v30, 0.0  ;;  %v1043_v30 = vrot.slane %v1034_v2, %v1800_v4 }
 0x241   :  { %v785_v40 = vpop.f32.mrf.mxu1  ;;  %v794_v42 = vadd.f32 %v793_v38, %v792_v32  ;;  %v805_v31 = vadd.f32 %v804_v39, %v803_v34  ;;  %v969_v32 = vld [vmem:[#allocation4 + $0x2] ss:$8 sm:$0xf]  ;;  %v1184_v34 = vcombine.low %v1178_v57, %v1182_v16  ;;  %v1313_v38 = vrot.slane %v1296_v46, %v1804_v6 }
 0x242   :  { %v806_v23 = vsel %vm61_vm6, %v800_v35, 0.0  ;;  %v1309_v35 = vrot.slane %v1296_v46, %v1802_v5  ;;  %v1052_v39 = vcombine.low %v1039_v28, %v1043_v30  ;;  %v974_v40 = vrot.slane %v969_v32, %v1798_v3 }
 0x243   :  { %v786_v43 = vpop.f32.mrf.mxu1  ;;  %795 = vadd.xlane.f32.xlu0 %v794_v42  ;;  %v807_v44 = vadd.f32 %v806_v23, %v805_v31  ;;  %v978_v42 = vrot.slane %v969_v32, %v1800_v4  ;;  %v1231_v31 = vld [vmem:[#allocation4 + $0x6] ss:$8 sm:$0xf] }
 0x244   :  { %v1315_v23 = vcombine.low %v1309_v35, %v1313_v38  ;;  %v1236_v43 = vrot.slane %v1231_v31, %v1798_v3  ;;  %v866_v35 = vld [vmem:[#allocation4] ss:$8 sm:$0xf] }
 0x245   :  { %808 = vadd.xlane.f32.xlu1 %v807_v44  ;;  %v1240_v44 = vrot.slane %v1231_v31, %v1800_v4  ;;  %v875_v7 = vrot.slane %v866_v35, %v1800_v4 }
 0x2cc   :  { %v796_v36 = vpop.xlane.xlu0 %795 }
 0x2cd   :  { %v810_v41 = vmul.f32 0.001953125, %v796_v36  ;;  %v987_v36 = vcombine.low %v974_v40, %v978_v42 }
 0x2ce   :  { %v809_v45 = vpop.xlane.xlu1 %808 }
 0x2cf   :  { %v812_v48 = vmul.f32 %v810_v41, %v810_v41  ;;  %v811_v51 = vmul.f32 0.001953125, %v809_v45  ;;  %v1244_v45 = vrot.slane %v1231_v31, %v1802_v5 }
 0x2d1   :  { %v813_v47 = vsub.f32 %v811_v51, %v812_v48  ;;  %v1248_v48 = vrot.slane %v1231_v31, %v1804_v6  ;;  %v879_v31 = vrot.slane %v866_v35, %v1802_v5 }
 0x2d3   :  { %v815_v37 = vadd.f32 1e-05, %v813_v47  ;;  %v1250_v51 = vcombine.low %v1244_v45, %v1248_v48  ;;  %v916_v47 = vrot.slane %v903_v8, %v1802_v5 }
 0x2d5   :  { %1679 = vrsqrt.f32 %v815_v37  ;;  %v920_v37 = vrot.slane %v903_v8, %v1804_v6 }
 0x2d7   :  { %v922_v46 = vcombine.low %v916_v47, %v920_v37 }
 0x2e2   :  { %v1680_v25 = vpop.eup %1679 }
 0x2e3   :  { %v817_v24 = vmul.f32 %v1680_v25, %v814_v52  ;;  %v1047_v52 = vrot.slane %v1034_v2, %v1802_v5 }
 0x2e5   :  { %823 = vperm.xlu0 %1675, %v817_v24   ;;  %v819_v56 = vmul.f32 %v817_v24, %v810_v41  ;;  %v1249_v41 = vcombine.low %v1236_v43, %v1240_v44  ;;  %v1053_v54 = vcombine.low %v1047_v52, %v1051_v53 }
 0x2e7   :  { %v820_v59 = vsub.f32 %v818_v18, %v819_v56 }
 0x2e9   :  { %832 = vperm.xlu1 %1676, %v820_v59   ;;  %1316 = vrot.lane.b32.xlu0 %v1314_v58, %s1734_s18 }
 0x2ed   :  { %1382 = vrot.lane.b32.xlu1 %v1380_v33, %s1732_s16  ;;  %1120 = vrot.lane.b32.xlu0 %v1118_v63, %s1731_s13 }
 0x2f1   :  { %1384 = vrot.lane.b32.xlu1 %v1381_v9, %s1732_s16  ;;  %1122 = vrot.lane.b32.xlu0 %v1119_v11, %s1731_s13 }
 0x2f5   :  { %1185 = vrot.lane.b32.xlu1 %v1183_v15, %s1733_s17  ;;  %923 = vrot.lane.b32.xlu0 %v921_v21, %s1735_s19 }
 0x2f9   :  { %1187 = vrot.lane.b32.xlu1 %v1184_v34, %s1733_s17  ;;  %1054 = vrot.lane.b32.xlu0 %v1052_v39, %s1736_s20  ;;  %v871_v39 = vrot.slane %v866_v35, %v1798_v3 }
 0x2fb   :  { %v884_v4 = vcombine.low %v871_v39, %v875_v7 }
 0x2fd   :  { %1318 = vrot.lane.b32.xlu1 %v1315_v23, %s1734_s18  ;;  %989 = vrot.lane.b32.xlu0 %v987_v36, %s1737_s21  ;;  %v883_v23 = vrot.slane %v866_v35, %v1804_v6 }
 0x301   :  { %1251 = vrot.lane.b32.xlu1 %v1249_v41, %s1729_s9 }
 0x305   :  { %1253 = vrot.lane.b32.xlu1 %v1250_v51, %s1729_s9 }
 0x309   :  { %925 = vrot.lane.b32.xlu1 %v922_v46, %s1735_s19 }
 0x30d   :  { %1056 = vrot.lane.b32.xlu1 %v1053_v54, %s1736_s20 }
 0x360   :  { %v824_v17 = vpop.permute.xlu0 %823 }
 0x361   :  { %v826_v25 = vmul.f32 %v824_v17, %v2118_v50  ;;  %v827_v26 = vmul.f32 %v824_v17, %v2120_v20  ;;  %v828_v24 = vmul.f32 %v824_v17, %v2132_v19  ;;  %v829_v18 = vmul.f32 %v824_v17, %v2138_v22 }
 0x362   :  { %v982_v50 = vrot.slane %v969_v32, %v1802_v5  ;;  %v986_v20 = vrot.slane %v969_v32, %v1804_v6  ;;  %v885_v5 = vcombine.low %v879_v31, %v883_v23 }
 0x364   :  { %v833_v27 = vpop.permute.xlu1 %832  ;;  %v988_v19 = vcombine.low %v982_v50, %v986_v20  ;;  %v2222_v11 = vpop.permute.xlu0 %1316 }
 0x365   :  { %v835_v55 = vadd.f32 %v833_v27, %v826_v25  ;;  %v836_v56 = vadd.f32 %v833_v27, %v827_v26  ;;  %v837_v58 = vadd.f32 %v833_v27, %v828_v24  ;;  %v838_v29 = vadd.f32 %v833_v27, %v829_v18 }
 0x366   :  { %v1320_v52 = vrot.slane %v2222_v11, 4 }
 0x367   :  { %v839_v13 = vmax.f32 %v835_v55, 0.0  ;;  %v840_v59 = vmax.f32 %v836_v56, 0.0  ;;  %v841_v60 = vmax.f32 %v837_v58, 0.0  ;;  %v842_v61 = vmax.f32 %v838_v29, 0.0 }
 0x368   :  { %v2206_v22 = vpop.permute.xlu1 %1382  ;;  %v2226_v14 = vpop.permute.xlu0 %1120  ;;  %v1322_v18 = vsel %vm549_vm10, %v1320_v52, %v2222_v11 }
 0x369   :  { %v847_v33 = vcombine.low %v839_v13, %v840_v59  ;;  %v848_v62 = vcombine.low %v841_v60, %v842_v61  ;;  %v1386_v24 = vrot.slane %v2206_v22, 4  ;;  %v1124_v27 = vrot.slane %v2226_v14, 4 }
 0x36b   :  { %849 = vrot.lane.b32.xlu1 %v847_v33, %s1731_s13  ;;  %v1126_v13 = vsel %vm59_vm4, %v1124_v27, %v2226_v14  ;;  %v1388_v33 = vsel %vm618_vm7, %v1386_v24, %v2206_v22 }
 0x36c   :  { %v2208_v63 = vpop.permute.xlu1 %1384  ;;  %v2231_v21 = vpop.permute.xlu0 %1122 }
 0x36d   :  { %v1387_v40 = vrot.slane %v2208_v63, 4  ;;  %v1125_v51 = vrot.slane %v2231_v21, 4 }
 0x36f   :  { %851 = vrot.lane.b32.xlu1 %v848_v62, %s1731_s13  ;;  %v1389_v11 = vsel %vm61_vm6, %v1386_v24, %v1387_v40 }
 0x370   :  { %v2210_v0 = vpop.permute.xlu1 %1185  ;;  %v2240_v38 = vpop.permute.xlu0 %923 }
 0x371   :  { %v1189_v43 = vrot.slane %v2210_v0, 4 }
 0x373   :  { %991 = vrot.lane.b32.xlu1 %v988_v19, %s1737_s21  ;;  %v1191_v6 = vsel %vm412_vm9, %v1189_v43, %v2210_v0  ;;  %v927_v19 = vrot.slane %v2240_v38, 4 }
 0x374   :  { %v2212_v1 = vpop.permute.xlu1 %1187  ;;  %v2254_v47 = vpop.permute.xlu0 %1054 }
 0x378   :  { %v2214_v8 = vpop.permute.xlu1 %1318  ;;  %v990_v25 = vpop.permute.xlu0 %989 }
 0x379   :  { %v993_v59 = vrot.slane %v990_v25, 4  ;;  %v1321_v39 = vrot.slane %v2214_v8, 4 }
 0x37b   :  { %v995_v20 = vsel %vm208_vm8, %v993_v59, %v990_v25 }
 0x37c   :  { %v2216_v9 = vpop.permute.xlu1 %1251 }
 0x37d   :  { %v1255_v60 = vrot.slane %v2216_v9, 4 }
 0x37f   :  { %v1257_v62 = vsel %vm481_vm11, %v1255_v60, %v2216_v9  ;;  %v1390_v9 = vsel %vm618_vm7, %v1389_v11, %v2208_v63 }
 0x380   :  { %v2218_v49 = vpop.permute.xlu1 %1253 }
 0x381   :  { %v1256_v17 = vrot.slane %v2218_v49, 4 }
 0x383   :  { %v1258_v7 = vsel %vm61_vm6, %v1255_v60, %v1256_v17 }
 0x384   :  { %v2220_v10 = vpop.permute.xlu1 %925  ;;  %v1259_v23 = vsel %vm481_vm11, %v1258_v7, %v2218_v49  ;;  %vm2531_vm11 = vcmask 1031168  }
 0x388   :  { %v2224_v12 = vpop.permute.xlu1 %1056 }
 0x3dd   :  { %v850_v2 = vpop.permute.xlu1 %849 }
 0x3de   :  { %v853_v15 = vrot.slane %v850_v2, 4 }
 0x3e0   :  { %v855_v57 = vsel %vm59_vm4, %v853_v15, %v850_v2 }
 0x3e1   :  { %861 = vst.msk [vmem:[#allocation2] sm:$0xff] %vm1862_vm5, %v855_v57  ;;  %v852_v16 = vpop.permute.xlu1 %851  ;;  %v1190_v57 = vrot.slane %v2212_v1, 4  ;;  %vm2525_vm5 = vcmask 130048  }
 0x3e2   :  { %v854_v28 = vrot.slane %v852_v16, 4  ;;  %vm2527_vm7 = vmmov %vm2525_vm5 }
 0x3e3   :  { %v1192_v63 = vsel %vm61_vm6, %v1189_v43, %v1190_v57  ;;  %v1323_v43 = vsel %vm61_vm6, %v1320_v52, %v1321_v39 }
 0x3e4   :  { %v856_v30 = vsel %vm61_vm6, %v853_v15, %v854_v28  ;;  %863 = vst.msk [vmem:[#allocation2 + $0x10] sm:$0xf] %vm45_vm0, %v854_v28  ;;  %vm2524_vm0 = vcmask 7168   ;;  %v1127_v15 = vsel %vm61_vm6, %v1124_v27, %v1125_v51  ;;  %v1193_v0 = vsel %vm412_vm9, %v1192_v63, %v2212_v1 }
 0x3e5   :  { %v2236_v32 = vsel %vm59_vm4, %v856_v30, %v852_v16  ;;  %v2238_v34 = vpop.permute.xlu1 %991  ;;  %v929_v2 = vsel %vm2524_vm0, %v927_v19, %v2240_v38  ;;  %v1058_v16 = vrot.slane %v2254_v47, 4  ;;  %v1128_v35 = vsel %vm59_vm4, %v1127_v15, %v2231_v21  ;;  %vm2526_vm4 = vmmov %vm2524_vm0 }
 0x3e6   :  { %v994_v42 = vrot.slane %v2238_v34, 4  ;;  %v889_v26 = vmul.f32 %v885_v5, %v2236_v32  ;;  %v2311_v28 = vmul.f32 %v1390_v9, %v2236_v32  ;;  %v2329_v21 = vmul.f32 %v1128_v35, %v2236_v32  ;;  %vm2532_vm0 = vmmov %vm2531_vm11 }
 0x3e7   :  { %v1060_v38 = vsel %vm2525_vm5, %v1058_v16, %v2254_v47  ;;  %v1324_v1 = vsel %vm549_vm10, %v1323_v43, %v2214_v8  ;;  %v1059_v27 = vrot.slane %v2224_v12, 4  ;;  %vm2529_vm9 = vcmask 777216  }
 0x3e8   :  { %v2251_v48 = vld [vmem:[#allocation2] sm:$0xff]  ;;  %v893_v29 = vcombine.high %v889_v26, %v889_v26  ;;  %898 = vst [vmem:[#allocation3 + $0x50] sm:$0xf] %v889_v26  ;;  %v996_v31 = vsel %vm61_vm6, %v993_v59, %v994_v42  ;;  %v1401_v59 = vcombine.high %v2311_v28, %v2311_v28  ;;  %v1139_v47 = vcombine.high %v2329_v21, %v2329_v21  ;;  %vm2533_vm5 = vmmov %vm2529_vm9 }
 0x3e9   :  { %v2263_v46 = vmul.f32 %v1191_v6, %v2251_v48  ;;  %v888_v54 = vmul.f32 %v2251_v48, %v884_v4  ;;  %v2277_v58 = vmul.f32 %v1322_v18, %v2251_v48  ;;  %v1394_v61 = vmul.f32 %v1388_v33, %v2251_v48 }
 0x3ea   :  { %899 = vst [vmem:[#allocation3 + $0x18] sm:$0xf] %v893_v29  ;;  %v1132_v50 = vmul.f32 %v1126_v13, %v2251_v48  ;;  %v2297_v22 = vmul.f32 %v995_v20, %v2251_v48  ;;  %v1263_v14 = vmul.f32 %v1257_v62, %v2251_v48  ;;  %v935_v30 = vmul.f32 %v2251_v48, %v929_v2 }
 0x3eb   :  { %v968_v44 = vld [vmem:[#allocation2 + $0x10] sm:$0xf]  ;;  %v892_v55 = vcombine.high %v888_v54, %v888_v54  ;;  %896 = vst [vmem:[#allocation3] sm:$0xf] %v888_v54  ;;  %v1400_v52 = vcombine.high %v1394_v61, %v1394_v61  ;;  %v1203_v26 = vcombine.low %v2263_v46, %v2263_v46 }
 0x3ec   :  { %v1361_v36 = vld [vmem:[#allocation2 + $0x10] sm:$0xf]  ;;  %v1003_v41 = vmul.f32 %v994_v42, %v968_v44  ;;  %v2344_v44 = vmul.f32 %v1259_v23, %v2236_v32  ;;  %v997_v42 = vsel %vm208_vm8, %v996_v31, %v2238_v34  ;;  %v1269_v24 = vcombine.high %v1263_v14, %v1263_v14 }
 0x3ed   :  { %v1396_v45 = vmul.f32 %v1387_v40, %v1361_v36  ;;  %v1099_v3 = vld [vmem:[#allocation2 + $0x10] sm:$0xf]  ;;  %897 = vst [vmem:[#allocation3 + $0x38] sm:$0xf] %v892_v55  ;;  %v1066_v40 = vmul.f32 %v1060_v38, %v2251_v48  ;;  %v1198_v36 = vmul.f32 %v1193_v0, %v2236_v32  ;;  %v928_v48 = vrot.slane %v2220_v10, 4 }
 0x3ee   :  { %1017 = vrot.lane.b32.xlu1 %v1003_v41, %s1741_s25  ;;  %v1134_v37 = vmul.f32 %v1125_v51, %v1099_v3  ;;  %v1230_v53 = vld [vmem:[#allocation2 + $0x10] sm:$0xf]  ;;  %v1002_v49 = vmul.f32 %v997_v42, %v2236_v32  ;;  %v1329_v3 = vmul.f32 %v1324_v1, %v2236_v32  ;;  %v1007_v18 = vcombine.high %v2297_v22, %v2297_v22 }
 0x3ef   :  { %1410 = vrot.lane.b32.xlu0 %v1396_v45, %s1738_s22  ;;  %v1265_v56 = vmul.f32 %v1256_v17, %v1230_v53  ;;  %v902_v41 = vld [vmem:[#allocation2 + $0x10] sm:$0xf]  ;;  %v930_v8 = vsel %vm61_vm6, %v927_v19, %v928_v48  ;;  %v1138_v17 = vcombine.high %v1132_v50, %v1132_v50  ;;  %v941_v55 = vcombine.low %v935_v30, %v935_v30 }
 0x3f0   :  { %v1164_v45 = vld [vmem:[#allocation2 + $0x10] sm:$0xf]  ;;  %v937_v4 = vmul.f32 %v928_v48, %v902_v41  ;;  %v931_v54 = vsel %vm2526_vm4, %v930_v8, %v2220_v10  ;;  %v1334_v10 = vcombine.low %v2277_v58, %v2277_v58  ;;  %v1072_v29 = vcombine.low %v1066_v40, %v1066_v40 }
 0x3f1   :  { %v1199_v51 = vmul.f32 %v1190_v57, %v1164_v45  ;;  %v1295_v5 = vld [vmem:[#allocation2 + $0x10] sm:$0xf]  ;;  %v936_v25 = vmul.f32 %v931_v54, %v2236_v32  ;;  %v1335_v13 = vcombine.low %v1329_v3, %v1329_v3  ;;  %v1270_v20 = vcombine.high %v2344_v44, %v2344_v44 }
 0x3f2   :  { %1208 = vrot.lane.b32.xlu1 %v2263_v46, %s1742_s26  ;;  %v943_v34 = vcombine.low %v937_v4, %v937_v4  ;;  %v1061_v46 = vsel %vm61_vm6, %v1058_v16, %v1059_v27  ;;  %vm2528_vm8 = vcmask 900096  }
 0x3f3   :  { %1148 = vrot.lane.b32.xlu0 %v1134_v37, %s1739_s23  ;;  %v1205_v6 = vcombine.low %v1199_v51, %v1199_v51  ;;  %v1330_v37 = vmul.f32 %v1321_v39, %v1295_v5  ;;  %v942_v33 = vcombine.low %v936_v25, %v936_v25  ;;  %vm2530_vm10 = vmmov %vm2528_vm8 }
 0x3f4   :  { %vm2534_vm4 = vmmov %vm2528_vm8 }
 0x3f5   :  { %v1336_v53 = vcombine.low %v1330_v37, %v1330_v37 }
 0x3f6   :  { %1339 = vrot.lane.b32.xlu1 %v2277_v58, %s1743_s27  ;;  %v1062_v58 = vsel %vm2527_vm7, %v1061_v46, %v2224_v12  ;;  %v1008_v12 = vcombine.high %v1002_v49, %v1002_v49  ;;  %vm2535_vm7 = vmmov %vm2534_vm4 }
 0x3f7   :  { %1279 = vrot.lane.b32.xlu0 %v1265_v56, %s1740_s24  ;;  %v1204_v56 = vcombine.low %v1198_v36, %v1198_v36  ;;  %v1067_v60 = vmul.f32 %v1062_v58, %v2236_v32 }
 0x3fa   :  { %1140 = vrot.lane.b32.xlu1 %v1132_v50, %s1739_s23  ;;  %v1033_v50 = vld [vmem:[#allocation2 + $0x10] sm:$0xf] }
 0x3fb   :  { %1402 = vrot.lane.b32.xlu0 %v1394_v61, %s1738_s22  ;;  %v1073_v61 = vcombine.low %v1067_v60, %v1067_v60  ;;  %v1068_v62 = vmul.f32 %v1059_v27, %v1033_v50 }
 0x3fd   :  { %v1074_v32 = vcombine.low %v1068_v62, %v1068_v62 }
 0x3fe   :  { %1271 = vrot.lane.b32.xlu1 %v1263_v14, %s1740_s24 }
 0x3ff   :  { %1009 = vrot.lane.b32.xlu0 %v2297_v22, %s1741_s25 }
 0x402   :  { %946 = vrot.lane.b32.xlu1 %v935_v30, %s1744_s28 }
 0x403   :  { %1406 = vrot.lane.b32.xlu0 %v2311_v28, %s1738_s22 }
 0x406   :  { %1077 = vrot.lane.b32.xlu1 %v1066_v40, %s1745_s29 }
 0x407   :  { %1144 = vrot.lane.b32.xlu0 %v2329_v21, %s1739_s23 }
 0x40a   :  { %1212 = vrot.lane.b32.xlu1 %v1198_v36, %s1742_s26 }
 0x40b   :  { %1275 = vrot.lane.b32.xlu0 %v2344_v44, %s1740_s24 }
 0x40e   :  { %1343 = vrot.lane.b32.xlu1 %v1329_v3, %s1743_s27 }
 0x40f   :  { %1013 = vrot.lane.b32.xlu0 %v1002_v49, %s1741_s25 }
 0x412   :  { %952 = vrot.lane.b32.xlu1 %v943_v34, %s1744_s28 }
 0x413   :  { %1214 = vrot.lane.b32.xlu0 %v1205_v6, %s1742_s26 }
 0x416   :  { %1404 = vrot.lane.b32.xlu1 %v1400_v52, %s1738_s22 }
 0x417   :  { %1345 = vrot.lane.b32.xlu0 %v1336_v53, %s1743_s27 }
 0x41a   :  { %1142 = vrot.lane.b32.xlu1 %v1138_v17, %s1739_s23 }
 0x41b   :  { %950 = vrot.lane.b32.xlu0 %v936_v25, %s1744_s28 }
 0x41e   :  { %1273 = vrot.lane.b32.xlu1 %v1269_v24, %s1740_s24 }
 0x41f   :  { %1206 = vrot.lane.b32.xlu0 %v1203_v26, %s1742_s26 }
 0x422   :  { %1011 = vrot.lane.b32.xlu1 %v1007_v18, %s1741_s25 }
 0x423   :  { %1337 = vrot.lane.b32.xlu0 %v1334_v10, %s1743_s27 }
 0x426   :  { %944 = vrot.lane.b32.xlu1 %v941_v55, %s1744_s28 }
 0x427   :  { %1210 = vrot.lane.b32.xlu0 %v1204_v56, %s1742_s26 }
 0x42a   :  { %1075 = vrot.lane.b32.xlu1 %v1072_v29, %s1745_s29 }
 0x42b   :  { %1341 = vrot.lane.b32.xlu0 %v1335_v13, %s1743_s27 }
 0x42e   :  { %1408 = vrot.lane.b32.xlu1 %v1401_v59, %s1738_s22 }
 0x42f   :  { %948 = vrot.lane.b32.xlu0 %v942_v33, %s1744_s28 }
 0x432   :  { %1146 = vrot.lane.b32.xlu1 %v1139_v47, %s1739_s23 }
 0x433   :  { %1079 = vrot.lane.b32.xlu0 %v1073_v61, %s1745_s29 }
 0x436   :  { %1277 = vrot.lane.b32.xlu1 %v1270_v20, %s1740_s24 }
 0x437   :  { %1015 = vrot.lane.b32.xlu0 %v1008_v12, %s1741_s25 }
 0x43a   :  { %1083 = vrot.lane.b32.xlu1 %v1074_v32, %s1745_s29 }
 0x43b   :  { %1081 = vrot.lane.b32.xlu0 %v1067_v60, %s1745_s29 }
 0x460   :  { %v2406_v11 = vpop.permute.xlu1 %1017 }
 0x461   :  { %v2404_v19 = vpop.permute.xlu0 %1410 }
 0x464   :  { %v1209_v14 = vpop.permute.xlu1 %1208 }
 0x465   :  { %v2408_v22 = vpop.permute.xlu0 %1148 }
 0x468   :  { %v2412_v15 = vpop.permute.xlu1 %1339 }
 0x469   :  { %v2410_v2 = vpop.permute.xlu0 %1279 }
 0x46c   :  { %v1141_v57 = vpop.permute.xlu1 %1140 }
 0x46d   :  { %v1403_v9 = vpop.permute.xlu0 %1402 }
 0x470   :  { %v1272_v28 = vpop.permute.xlu1 %1271 }
 0x471   :  { %v1010_v16 = vpop.permute.xlu0 %1009 }
 0x474   :  { %v2416_v35 = vpop.permute.xlu1 %946 }
 0x475   :  { %v2414_v30 = vpop.permute.xlu0 %1406 }
 0x478   :  { %v2420_v63 = vpop.permute.xlu1 %1077 }
 0x479   :  { %v2418_v38 = vpop.permute.xlu0 %1144 }
 0x47c   :  { %v1213_v7 = vpop.permute.xlu1 %1212 }
 0x47d   :  { %v2422_v39 = vpop.permute.xlu0 %1275 }
 0x480   :  { %v1344_v21 = vpop.permute.xlu1 %1343 }
 0x481   :  { %v2424_v40 = vpop.permute.xlu0 %1013 }
 0x484   :  { %v953_v31 = vpop.permute.xlu1 %952 }
 0x485   :  { %v1215_v0 = vpop.permute.xlu0 %1214 }
 0x486   :  { %v1219_v23 = vsel %vm2528_vm8, %v1213_v7, %v1215_v0  ;;  %vm2536_vm8 = vmmov %vm2533_vm5 }
 0x487   :  { %1227 = vst [vmem:[#allocation3 + $0x40] sm:$0xf0] %v1219_v23 }
 0x488   :  { %v1405_v43 = vpop.permute.xlu1 %1404 }
 0x489   :  { %v1346_v44 = vpop.permute.xlu0 %1345  ;;  %v1412_v36 = vsel %vm643_vm2, %v1403_v9, %v1405_v43  ;;  %v1413_v42 = vsel %vm643_vm2, %v1405_v43, %v2414_v30 }
 0x48a   :  { %v1350_v41 = vsel %vm2529_vm9, %v1344_v21, %v1346_v44  ;;  %1420 = vst [vmem:[#allocation3 + $0x20] sm:$0xf] %v1412_v36  ;;  %1421 = vst [vmem:[#allocation3 + $0x48] sm:$0xf] %v1413_v42 }
 0x48b   :  { %1358 = vst [vmem:[#allocation3 + $0x60] sm:$0xf0] %v1350_v41  ;;  %vm2537_vm9 = vmmov %vm2533_vm5 }
 0x48c   :  { %v1143_v45 = vpop.permute.xlu1 %1142 }
 0x48d   :  { %v951_v48 = vpop.permute.xlu0 %950  ;;  %v1150_v1 = vsel %vm369_vm3, %v1141_v57, %v1143_v45  ;;  %v1151_v49 = vsel %vm369_vm3, %v1143_v45, %v2418_v38 }
 0x48e   :  { %v957_v3 = vsel %vm165_vm1, %v951_v48, %v953_v31  ;;  %1158 = vst [vmem:[#allocation3 + $0x8] sm:$0xf] %v1150_v1  ;;  %1159 = vst [vmem:[#allocation3 + $0x88] sm:$0xf] %v1151_v49 }
 0x48f   :  { %965 = vst [vmem:[#allocation3 + $0x18] sm:$0xf0] %v957_v3  ;;  %v1456_v3 = vld [vmem:[%s2512_s4] sm:$0x3] }
 0x490   :  { %v1274_v4 = vpop.permute.xlu1 %1273 }
 0x491   :  { %v1207_v51 = vpop.permute.xlu0 %1206  ;;  %v1281_v5 = vsel %vm506_vm14, %v1272_v28, %v1274_v4  ;;  %v1282_v34 = vsel %vm506_vm14, %v1274_v4, %v2422_v39  ;;  %v1441_v37 = vld [vmem:[#allocation3 + $0x48] sm:$0xf]  ;;  %v1440_v8 = vld [vmem:[#allocation3 + $0x20] sm:$0xf] }
 0x492   :  { %v1216_v6 = vsel %vm2530_vm10, %v1207_v51, %v1209_v14  ;;  %1289 = vst [vmem:[#allocation3 + $0x58] sm:$0xf] %v1281_v5  ;;  %1290 = vst [vmem:[#allocation3 + $0x10] sm:$0xf] %v1282_v34  ;;  %v1453_v52 = vpack.c.bf16 %v1441_v37, %v1441_v37  ;;  %v1452_v53 = vpack.c.bf16 %v1440_v8, %v1440_v8 }
 0x493   :  { %1224 = vst [vmem:[#allocation3 + $0x8] sm:$0xf0] %v1216_v6 }
 0x494   :  { %1650 = vmatprep.subr.msk.bf16.mxu0 %vm693_vm13, %v1453_v52  ;;  %v1012_v54 = vpop.permute.xlu1 %1011  ;;  %v1461_v25 = vsel %vm693_vm13, %v1452_v53, 0 }
 0x495   :  { %v1338_v17 = vpop.permute.xlu0 %1337  ;;  %v1019_v26 = vsel %vm2531_vm11, %v1010_v16, %v1012_v54  ;;  %v1020_v24 = vsel %vm2532_vm0, %v1012_v54, %v2424_v40  ;;  %1483 = vmatpush1.bf16.msra.mxu0 %v1461_v25 }
 0x496   :  { %v1347_v18 = vsel %vm2533_vm5, %v1338_v17, %v2412_v15  ;;  %1027 = vst [vmem:[#allocation3 + $0x30] sm:$0xf] %v1019_v26  ;;  %1028 = vst [vmem:[#allocation3 + $0x68] sm:$0xf] %v1020_v24  ;;  %v1427_v8 = vld [vmem:[#allocation3 + $0x18] sm:$0xff] }
 0x497   :  { %1355 = vst [vmem:[#allocation3 + $0x58] sm:$0xf0] %v1347_v18 }
 0x498   :  { %v945_v10 = vpop.permute.xlu1 %944 }
 0x499   :  { %v1211_v27 = vpop.permute.xlu0 %1210  ;;  %v954_v55 = vsel %vm165_vm1, %v945_v10, %v2416_v35 }
 0x49a   :  { %v1217_v56 = vsel %vm2534_vm4, %v1209_v14, %v1211_v27  ;;  %v1218_v46 = vsel %vm2535_vm7, %v1211_v27, %v1213_v7  ;;  %962 = vst [vmem:[#allocation3] sm:$0xf0] %v954_v55 }
 0x49b   :  { %1225 = vst [vmem:[#allocation3 + $0x88] sm:$0xf0] %v1217_v56  ;;  %1226 = vst [vmem:[#allocation3 + $0x28] sm:$0xf0] %v1218_v46 }
 0x49c   :  { %v1076_v29 = vpop.permute.xlu1 %1075 }
 0x49d   :  { %v1342_v13 = vpop.permute.xlu0 %1341  ;;  %v1085_v58 = vsel %vm302_vm15, %v1076_v29, %v2420_v63 }
 0x49e   :  { %v1348_v59 = vsel %vm2536_vm8, %v2412_v15, %v1342_v13  ;;  %v1349_v33 = vsel %vm2537_vm9, %v1342_v13, %v1344_v21  ;;  %1093 = vst [vmem:[#allocation3 + $0x30] sm:$0xf0] %v1085_v58  ;;  %v1436_v14 = vld [vmem:[#allocation3 + $0x58] sm:$0xff] }
 0x49f   :  { %1356 = vst [vmem:[#allocation3 + $0x10] sm:$0xf0] %v1348_v59  ;;  %1357 = vst [vmem:[#allocation3 + $0x98] sm:$0xf0] %v1349_v33 }
 0x4a0   :  { %v1409_v60 = vpop.permute.xlu1 %1408 }
 0x4a1   :  { %v949_v47 = vpop.permute.xlu0 %948  ;;  %v1414_v61 = vsel %vm643_vm2, %v2414_v30, %v1409_v60  ;;  %v1415_v50 = vsel %vm643_vm2, %v1409_v60, %v2404_v19  ;;  %v1432_v30 = vld [vmem:[#allocation3 + $0x8] sm:$0xff]  ;;  %vm2539_vm2 = vmmov %vm2532_vm0  ;;  %v1424_v1 = vld [vmem:[#allocation3] sm:$0xff] }
 0x4a2   :  { %v955_v12 = vsel %vm165_vm1, %v2416_v35, %v949_v47  ;;  %v956_v20 = vsel %vm165_vm1, %v949_v47, %v951_v48  ;;  %1422 = vst [vmem:[#allocation3 + $0x70] sm:$0xf] %v1414_v61  ;;  %1423 = vst [vmem:[#allocation3 + $0x90] sm:$0xf] %v1415_v50  ;;  %v1433_v57 = vld [vmem:[#allocation3 + $0x88] sm:$0xff]  ;;  %v1448_v35 = vpack.c.bf16 %v1436_v14, %v1432_v30 }
 0x4a3   :  { %963 = vst [vmem:[#allocation3 + $0x38] sm:$0xf0] %v955_v12  ;;  %964 = vst [vmem:[#allocation3 + $0x50] sm:$0xf0] %v956_v20 }
 0x4a4   :  { %v1147_v62 = vpop.permute.xlu1 %1146  ;;  %vm2538_vm1 = vmmov %vm2532_vm0 }
 0x4a5   :  { %v1080_v32 = vpop.permute.xlu0 %1079  ;;  %v1152_v15 = vsel %vm369_vm3, %v2418_v38, %v1147_v62  ;;  %v1153_v9 = vsel %vm369_vm3, %v1147_v62, %v2408_v22  ;;  %v1428_v42 = vld [vmem:[#allocation3 + $0x30] sm:$0xff] }
 0x4a6   :  { %v1086_v19 = vsel %vm302_vm15, %v2420_v63, %v1080_v32  ;;  %v1437_v16 = vld [vmem:[#allocation3 + $0x10] sm:$0xff]  ;;  %1160 = vst [vmem:[#allocation3 + $0x28] sm:$0xf] %v1152_v15  ;;  %1161 = vst [vmem:[#allocation3 + $0x40] sm:$0xf] %v1153_v9  ;;  %v1444_v49 = vpack.c.bf16 %v1428_v42, %v1424_v1 }
 0x4a7   :  { %1094 = vst [vmem:[#allocation3 + $0x68] sm:$0xf0] %v1086_v19  ;;  %v1449_v28 = vpack.c.bf16 %v1437_v16, %v1433_v57 }
 0x4a8   :  { %v1278_v7 = vpop.permute.xlu1 %1277 }
 0x4a9   :  { %1484 = vmatprep.subr.bf16.mxu0 %v1449_v28  ;;  %v1016_v21 = vpop.permute.xlu0 %1015  ;;  %v1283_v38 = vsel %vm506_vm14, %v2422_v39, %v1278_v7  ;;  %v1284_v22 = vsel %vm506_vm14, %v1278_v7, %v2410_v2  ;;  %v1443_v0 = vld [vmem:[#allocation3 + $0x90] sm:$0xf] }
 0x4aa   :  { %v1021_v63 = vsel %vm2538_vm1, %v2424_v40, %v1016_v21  ;;  %v1022_v31 = vsel %vm2539_vm2, %v1016_v21, %v2406_v11  ;;  %1485 = vmatpush1.bf16.msra.mxu0 %v1448_v35  ;;  %v1442_v23 = vld [vmem:[#allocation3 + $0x70] sm:$0xf]  ;;  %1291 = vst [vmem:[#allocation3 + $0x98] sm:$0xf] %v1283_v38  ;;  %1292 = vst [vmem:[#allocation3 + $0x60] sm:$0xf] %v1284_v22  ;;  %v1455_v43 = vpack.c.bf16 %v1443_v0, %v1443_v0 }
 0x4ab   :  { %1029 = vst [vmem:[#allocation3 + $0x78] sm:$0xf] %v1021_v63  ;;  %1030 = vst [vmem:[#allocation3 + $0x80] sm:$0xf] %v1022_v31  ;;  %v1454_v44 = vpack.c.bf16 %v1442_v23, %v1442_v23  ;;  %v1425_v41 = vld [vmem:[#allocation3 + $0x38] sm:$0xff]  ;;  %v1426_v53 = vld [vmem:[#allocation3 + $0x50] sm:$0xff] }
 0x4ac   :  { %1652 = vmatprep.subr.msk.bf16.mxu1 %vm693_vm13, %v1455_v43  ;;  %v1084_v39 = vpop.permute.xlu1 %1083  ;;  %v1580_v22 = vld [vmem:[%s2513_s5] sm:$0xf]  ;;  %s1747_s5 = smov [#allocation7]  }
 0x4ad   :  { %v1082_v36 = vpop.permute.xlu0 %1081  ;;  %v1467_v2 = vsel %vm693_vm13, %v1454_v44, 0  ;;  %v1435_v4 = vld [vmem:[#allocation3 + $0x40] sm:$0xff]  ;;  %v1434_v5 = vld [vmem:[#allocation3 + $0x28] sm:$0xff] }
 0x4ae   :  { %v1087_v40 = vsel %vm302_vm15, %v1080_v32, %v1082_v36  ;;  %v1088_v11 = vsel %vm302_vm15, %v1082_v36, %v1084_v39  ;;  %1524 = vmatpush1.bf16.msra.mxu1 %v1467_v2  ;;  %v1429_v45 = vld [vmem:[#allocation3 + $0x68] sm:$0xff]  ;;  %v1606_v39 = vld [vmem:[%s2508_s0 + $0x8] sm:$0xff] }
 0x4af   :  { %1095 = vst [vmem:[#allocation3 + $0x78] sm:$0xf0] %v1087_v40  ;;  %1096 = vst [vmem:[#allocation3 + $0x80] sm:$0xf0] %v1088_v11  ;;  %v1445_v48 = vpack.c.bf16 %v1429_v45, %v1425_v41  ;;  %v1584_v0 = vld [vmem:[%s2514_s6] sm:$0xf]  ;;  %v1610_v42 = vcombine.high %v1606_v39, %v1606_v39 }
 0x4b0   :  { %v1605_v44 = vld [vmem:[%s2508_s0] sm:$0xff]  ;;  %s1637_s6 = sshll.u32 %s1747_s5, 4  ;;  %s1638_s6 = int_to_ptr.vmem [resolvable:$true] %s1637_s6 }
 0x4b1   :  { %1486 = vmatprep.subr.bf16.mxu0 %v1445_v48  ;;  %v1439_v51 = vld [vmem:[#allocation3 + $0x60] sm:$0xff]  ;;  %v1438_v34 = vld [vmem:[#allocation3 + $0x98] sm:$0xff]  ;;  %v1609_v2 = vcombine.high %v1605_v44, %v1605_v44  ;;  %s1703_s0 = scalar_lea.vmem %s1638_s6, 256  ;;  %p1708_p6 = scmp.lt.s32.totalorder %s1638_s6, %s1638_s6 }
 0x4b2   :  { %1487 = vmatpush1.bf16.msra.mxu0 %v1444_v49  ;;  %v1451_v6 = vpack.c.bf16 %v1439_v51, %v1435_v4  ;;  %v1450_v37 = vpack.c.bf16 %v1438_v34, %v1434_v5  ;;  %p1704_p5 = scmp.ne.s32.totalorder %s1638_s6, %s1703_s0  ;;  %p1709_p7 = scmp.lt.s32.totalorder %s1703_s0, %s1703_s0 }
 0x4b4   :  { %1525 = vmatprep.subr.bf16.mxu1 %v1451_v6  ;;  %p1710_p8 = por %p1709_p7, %p1708_p6 }
 0x4b5   :  { %1651 = vmatmul.mubr.msk.bf16.vlgmr.msra.gmra.mxu0 %vm689_vm12, %v1456_v3  ;;  %1526 = vmatpush1.bf16.msra.mxu1 %v1450_v37 }
 0x4b6   :  { %v1431_v52 = vld [vmem:[#allocation3 + $0x80] sm:$0xff]  ;;  %v1430_v54 = vld [vmem:[#allocation3 + $0x78] sm:$0xff]  ;;  %p1711_p9 = pnand %p1710_p8, %p1704_p5 }
 0x4b7   :  { %v1447_v17 = vpack.c.bf16 %v1431_v52, %v1427_v8  ;;  %v1446_v25 = vpack.c.bf16 %v1430_v54, %v1426_v53 }
 0x4b9   :  { %1527 = vmatprep.subr.bf16.mxu1 %v1447_v17 }
 0x4ba   :  { %1528 = vmatpush1.bf16.msra.mxu1 %v1446_v25 }
 0x4bd   :  { %1653 = vmatmul.mubr.msk.bf16.vlgmr.msra.gmra.mxu1 %vm689_vm12, %v1456_v3 }
 0x575   :  { %v1506_v26 = vpop.f32.mrf.mxu0 }
 0x576   :  { %v1563_v18 = vmul.f32 %v1506_v26, %v1506_v26  ;;  %v1554_v55 = vsel %vm61_vm6, %v1506_v26, 0.0 }
 0x577   :  { %v1508_v24 = vpop.f32.mrf.mxu0 }
 0x578   :  { %v1564_v10 = vmul.f32 %v1508_v24, %v1508_v24  ;;  %v1555_v56 = vsel %vm61_vm6, %v1508_v24, 0.0  ;;  %v1567_v29 = vsel %vm61_vm6, %v1563_v18, 0.0 }
 0x579   :  { %v1510_v27 = vpop.f32.mrf.mxu0  ;;  %v1556_v58 = vadd.f32 %v1555_v56, %v1554_v55 }
 0x57a   :  { %v1568_v13 = vsel %vm61_vm6, %v1564_v10, 0.0 }
 0x57b   :  { %v1511_v46 = vpop.f32.mrf.mxu0  ;;  %v1569_v47 = vadd.f32 %v1568_v13, %v1567_v29 }
 0x57d   :  { %v1547_v59 = vpop.f32.mrf.mxu1 }
 0x57e   :  { %v1557_v33 = vsel %vm61_vm6, %v1547_v59, 0.0  ;;  %v1565_v60 = vmul.f32 %v1547_v59, %v1547_v59 }
 0x57f   :  { %v1558_v61 = vadd.f32 %v1557_v33, %v1556_v58  ;;  %v1549_v50 = vpop.f32.mrf.mxu1 }
 0x580   :  { %v1570_v12 = vsel %vm61_vm6, %v1565_v60, 0.0  ;;  %v1559_v20 = vsel %vm61_vm6, %v1549_v50, 0.0  ;;  %v1566_v62 = vmul.f32 %v1549_v50, %v1549_v50 }
 0x581   :  { %v1551_v32 = vpop.f32.mrf.mxu1  ;;  %v1560_v14 = vadd.f32 %v1559_v20, %v1558_v61  ;;  %v1571_v15 = vadd.f32 %v1570_v12, %v1569_v47 }
 0x582   :  { %v1572_v9 = vsel %vm61_vm6, %v1566_v62, 0.0 }
 0x583   :  { %v1552_v19 = vpop.f32.mrf.mxu1  ;;  %1561 = vadd.xlane.f32.xlu0 %v1560_v14  ;;  %v1573_v57 = vadd.f32 %v1572_v9, %v1571_v15 }
 0x585   :  { %1574 = vadd.xlane.f32.xlu1 %v1573_v57 }
 0x60c   :  { %v1562_v16 = vpop.xlane.xlu0 %1561 }
 0x60d   :  { %v1576_v28 = vmul.f32 0.001953125, %v1562_v16 }
 0x60e   :  { %v1575_v30 = vpop.xlane.xlu1 %1574 }
 0x60f   :  { %v1578_v35 = vmul.f32 %v1576_v28, %v1576_v28  ;;  %v1577_v7 = vmul.f32 0.001953125, %v1575_v30 }
 0x611   :  { %v1579_v21 = vsub.f32 %v1577_v7, %v1578_v35 }
 0x613   :  { %v1581_v38 = vadd.f32 1e-05, %v1579_v21 }
 0x615   :  { %1681 = vrsqrt.f32 %v1581_v38 }
 0x622   :  { %v1682_v63 = vpop.eup %1681 }
 0x623   :  { %v1583_v31 = vmul.f32 %v1682_v63, %v1580_v22 }
 0x625   :  { %1589 = vperm.xlu0 %1675, %v1583_v31   ;;  %v1585_v23 = vmul.f32 %v1583_v31, %v1576_v28 }
 0x627   :  { %v1586_v43 = vsub.f32 %v1584_v0, %v1585_v23 }
 0x629   :  { %1598 = vperm.xlu1 %1676, %v1586_v43  }
 0x6a0   :  { %v1590_v36 = vpop.permute.xlu0 %1589 }
 0x6a1   :  { %v1592_v40 = vmul.f32 %v1590_v36, %v1506_v26  ;;  %v1593_v11 = vmul.f32 %v1590_v36, %v1508_v24  ;;  %v1594_v41 = vmul.f32 %v1590_v36, %v1547_v59  ;;  %v1595_v45 = vmul.f32 %v1590_v36, %v1549_v50 }
 0x6a4   :  { %v1599_v48 = vpop.permute.xlu1 %1598 }
 0x6a5   :  { %v1601_v1 = vadd.f32 %v1599_v48, %v1592_v40  ;;  %v1602_v49 = vadd.f32 %v1599_v48, %v1593_v11  ;;  %v1603_v3 = vadd.f32 %v1599_v48, %v1594_v41  ;;  %v1604_v4 = vadd.f32 %v1599_v48, %v1595_v45 }
 0x6a7   :  { %v1613_v51 = vadd.f32 %v1605_v44, %v1601_v1  ;;  %v1614_v5 = vadd.f32 %v1609_v2, %v1602_v49  ;;  %v1615_v34 = vadd.f32 %v1606_v39, %v1603_v3  ;;  %v1616_v6 = vadd.f32 %v1610_v42, %v1604_v4 }
 0x6a9   :  { %v1617_v37 = vmax.f32 %v1613_v51, 0.0  ;;  %v1618_v8 = vmax.f32 %v1614_v5, 0.0  ;;  %v1619_v52 = vmax.f32 %v1615_v34, 0.0  ;;  %v1620_v53 = vmax.f32 %v1616_v6, 0.0 }
 0x6ab   :  { %v1625_v54 = vcombine.low %v1617_v37, %v1618_v8  ;;  %v1626_v17 = vcombine.low %v1619_v52, %v1620_v53 }
 0x6ad   :  { %1629 = vst [vmem:[#allocation7] sm:$0xff] %v1625_v54  ;;  %1630 = vst [vmem:[#allocation7 + $0x8] sm:$0xff] %v1626_v17 }
 0x6ae   :  { %1714 = shalt.err (!%p1711_p9)
}
 0x6af   :  { %1640 = dma.vmem_to_hbm [thread:$0]  %s1638_s6, 256, %s2516_s8, [#allocation6]  }
 0x6b0   :  { %1725 = dma.done.wait [#allocation6], 256  }
 0x6b1   :  { %1726 = vsyncadd [#allocation6], 4294967040 }
 0x6b2   :  { %1644 = vsyncpa [#allocation5], 1 }
 0x6b3   :  { %1645 = vsyncpa [#allocation6], 1 }

</bundles_post_ra>
